<compile_context>
chip_gen: v7x
topology: tpu7x:2x2x1
jax: 0.10.0
libtpu: 0.0.40
codegen_flags: <defaults>
</compile_context>

<pallas_src>
import jax
import jax.numpy as jnp
from jax.experimental import pallas as pl
from jax.experimental.pallas import tpu as pltpu


def _const_index_map(ndim):
    zeros = (0,) * ndim
    return lambda i: zeros


def _make_gat_kernel(layer_cfg, return_hid):
    """Build a fused forward kernel.

    layer_cfg: tuple of (f_in, heads, f_out, concat, apply_elu) per layer.
    Kernel ref order:
      x_ref [N, F_in0], adj_bias_ref [N, N],
      (W_ref [f_in, H*f_out], A_ref [H*f_out, 2H], b_ref [1, out_dim]) * L,
      out_ref [N, out_dim_last]  [, hid_ref [N, hid_dim]]
    """
    num_layers = len(layer_cfg)

    def kernel(*refs):
        n_out = 2 if return_hid else 1
        x_ref, adjb_ref = refs[0], refs[1]
        param_refs = refs[2:len(refs) - n_out]
        out_ref = refs[len(refs) - n_out]
        hid_ref = refs[-1] if return_hid else None

        x = x_ref[...].astype(jnp.float32)          # [N, F_in]
        adjb = adjb_ref[...]                        # [N, N] additive mask bias

        for li, (f_in, heads, f_out, concat, apply_elu) in enumerate(layer_cfg):
            w_ref, a_ref, b_ref = param_refs[3 * li:3 * li + 3]
            W = w_ref[...]                          # [f_in, heads*f_out]
            A = a_ref[...]                          # [heads*f_out, 2*heads]
            b = b_ref[...]                          # [1, out_dim]

            # All-heads projection (single MXU matmul, lane-dense output).
            xw = jnp.dot(x, W, preferred_element_type=jnp.float32)   # [N, H*F]

            # All-heads attention logits via one matmul against the
            # block-diagonal attention matrix: cols [0,H) = a_src, [H,2H) = a_dst.
            alpha = jnp.dot(xw, A, preferred_element_type=jnp.float32)  # [N, 2H]

            head_outs = []
            for h in range(heads):
                a_src_h = alpha[:, h:h + 1]                       # [N, 1]
                a_dst_h = alpha[:, heads + h:heads + h + 1]       # [N, 1]
                # e[i, j] = LeakyReLU(a_dst[i] + a_src[j]) + mask_bias[i, j]
                scores = a_dst_h + a_src_h.T                      # [N, N]
                e = jnp.where(scores > 0, scores, 0.2 * scores) + adjb
                # Softmax over source nodes j (masked entries underflow to 0).
                m = jnp.max(e, axis=-1, keepdims=True)
                p = jnp.exp(e - m)
                denom = jnp.maximum(
                    jnp.sum(p, axis=-1, keepdims=True), 1e-20)
                attn = p * pl.reciprocal(denom, approx=True)      # [N, N]
                xw_h = xw[:, h * f_out:(h + 1) * f_out]           # [N, F_out]
                head_outs.append(
                    jnp.dot(attn, xw_h, preferred_element_type=jnp.float32))

            if concat:
                y = (jnp.concatenate(head_outs, axis=-1)
                     if heads > 1 else head_outs[0])
            else:
                y = head_outs[0]
                for ho in head_outs[1:]:
                    y = y + ho
                y = y * (1.0 / heads)

            y = y + b                                             # fused bias

            if return_hid and li == num_layers - 2:
                hid_ref[...] = y.astype(hid_ref.dtype)

            if apply_elu:                                         # fused ELU
                y = jnp.where(y > 0, y, jnp.exp(y) - 1.0)
            # nn.Dropout(p=0.6) / attention dropout: identity in eval mode.
            x = y

        out_ref[...] = x.astype(out_ref.dtype)

    return kernel


def gat_forward(params, layer_cfg, x, adj_bias, return_hid=False):
    """Fused multi-layer GAT forward in a single pallas_call."""
    N = x.shape[0]
    _, h_last, f_last, c_last, _ = layer_cfg[-1]
    out_dim = h_last * f_last if c_last else f_last

    inputs = [x, adj_bias]
    for W, A, b in params:
        inputs += [W, A, b]

    out_shapes = [jax.ShapeDtypeStruct((N, out_dim), jnp.float32)]
    if return_hid:
        if len(layer_cfg) < 2:
            raise ValueError("return_hid requires num_layers >= 2")
        _, hh, hf, hc, _ = layer_cfg[-2]
        hid_dim = hh * hf if hc else hf
        out_shapes.append(jax.ShapeDtypeStruct((N, hid_dim), jnp.float32))

    kernel = _make_gat_kernel(tuple(layer_cfg), return_hid)

    in_specs = [pl.BlockSpec(a.shape, _const_index_map(a.ndim)) for a in inputs]
    out_specs = [pl.BlockSpec(s.shape, _const_index_map(len(s.shape)))
                 for s in out_shapes]

    result = pl.pallas_call(
        kernel,
        out_shape=tuple(out_shapes) if return_hid else out_shapes[0],
        grid_spec=pltpu.PrefetchScalarGridSpec(
            num_scalar_prefetch=0,
            grid=(1,),
            in_specs=in_specs,
            out_specs=tuple(out_specs) if return_hid else out_specs[0],
        ),
        compiler_params=pltpu.CompilerParams(
            dimension_semantics=("arbitrary",)),
    )(*inputs)
    return result


def init_gatconv(key, f_in, f_out, heads, concat):
    """Per-layer params in kernel-friendly fused layout."""
    k1, k2, k3 = jax.random.split(key, 3)
    w_scale = 1.0 / jnp.sqrt(jnp.float32(f_in))
    a_scale = 1.0 / jnp.sqrt(jnp.float32(f_out))
    W = jax.random.normal(k1, (heads, f_in, f_out), jnp.float32) * w_scale
    a_src = jax.random.normal(k2, (heads, f_out), jnp.float32) * a_scale
    a_dst = jax.random.normal(k3, (heads, f_out), jnp.float32) * a_scale

    # Fused projection: W_all[k, h*f_out + c] = W[h, k, c]  (concat layout).
    W_all = jnp.transpose(W, (1, 0, 2)).reshape(f_in, heads * f_out)

    # Block-diagonal attention matrix so that (xw_all @ A)[:, h]   = <xw_h, a_src_h>
    #                                        (xw_all @ A)[:, H+h] = <xw_h, a_dst_h>
    A = jnp.zeros((heads * f_out, 2 * heads), jnp.float32)
    for h in range(heads):
        A = A.at[h * f_out:(h + 1) * f_out, h].set(a_src[h])
        A = A.at[h * f_out:(h + 1) * f_out, heads + h].set(a_dst[h])

    out_dim = heads * f_out if concat else f_out
    bias = jnp.zeros((1, out_dim), jnp.float32)
    return W_all, A, bias


def init_gat_params(key, in_channels, hidden_channels, out_channels,
                    num_layers, heads):
    keys = jax.random.split(key, max(num_layers, 2))
    params, layer_cfg = [], []
    if num_layers == 1:
        params.append(init_gatconv(keys[0], in_channels, out_channels, 1, True))
        layer_cfg.append((in_channels, 1, out_channels, True, False))
    else:
        params.append(
            init_gatconv(keys[0], in_channels, hidden_channels, heads, True))
        layer_cfg.append((in_channels, heads, hidden_channels, True, True))
        for l in range(num_layers - 2):
            params.append(init_gatconv(keys[l + 1], heads * hidden_channels,
                                       hidden_channels, heads, True))
            layer_cfg.append((heads * hidden_channels, heads, hidden_channels,
                              True, True))
        params.append(init_gatconv(keys[num_layers - 1],
                                   heads * hidden_channels, out_channels,
                                   1, False))
        layer_cfg.append((heads * hidden_channels, 1, out_channels,
                          False, False))
    return params, layer_cfg


def build_adj_bias(edge_index, num_nodes):
    # adj[i, j] = 1 iff edge j -> i (edge_index[0]=src, edge_index[1]=dst),
    # plus self-loops (PyG GATConv default add_self_loops=True).
    # Returned as an additive softmax bias: 0 where edge, -1e9 where no edge.
    adj = jnp.zeros((num_nodes, num_nodes), jnp.float32)
    adj = adj.at[edge_index[1], edge_index[0]].set(1.0)
    adj = jnp.maximum(adj, jnp.eye(num_nodes, dtype=jnp.float32))
    return (adj - 1.0) * 1e9


def gat_forward_ref(params, layer_cfg, x, adj_bias):
    """Pure-JAX reference mirroring the kernel math (for validation)."""
    for (W, A, b), (f_in, heads, f_out, concat, apply_elu) in zip(params,
                                                                  layer_cfg):
        xw = x @ W
        alpha = xw @ A
        outs = []
        for h in range(heads):
            sc = alpha[:, heads + h][:, None] + alpha[:, h][None, :]
            e = jnp.where(sc > 0, sc, 0.2 * sc) + adj_bias
            p = jax.nn.softmax(e, axis=-1)
            outs.append(p @ xw[:, h * f_out:(h + 1) * f_out])
        y = (jnp.concatenate(outs, -1) if concat else sum(outs) / heads) + b
        x = jnp.where(y > 0, y, jnp.exp(y) - 1.0) if apply_elu else y
    return x


if __name__ == "__main__":
    # Small, module-consistent shapes.
    N = 32                 # number of graph nodes
    in_channels = 8
    hidden_channels = 16
    out_channels = 4
    num_layers = 2
    heads = 4

    key = jax.random.PRNGKey(0)
    kx, kp = jax.random.split(key)

    # Node features [N, F_in].
    x = jax.random.normal(kx, (N, in_channels), jnp.float32)

    # Deterministic, duplicate-free edge set: ring + skip-2 connections.
    nodes = jnp.arange(N, dtype=jnp.int32)
    src = jnp.concatenate([nodes, nodes])
    dst = jnp.concatenate([(nodes + 1) % N, (nodes + 2) % N])
    edge_index = jnp.stack([src, dst]).astype(jnp.int32)   # [2, 2N]

    adj_bias = build_adj_bias(edge_index, N)

    params, layer_cfg = init_gat_params(kp, in_channels, hidden_channels,
                                        out_channels, num_layers, heads)

    out = gat_forward(params, layer_cfg, x, adj_bias)
    jax.block_until_ready(out)
    assert out.shape == (N, out_channels)

    ref = gat_forward_ref(params, layer_cfg, x, adj_bias)
    assert bool(jnp.allclose(out, ref, atol=1e-2, rtol=1e-2)), (
        "kernel/reference mismatch")

    print("KERNEL_OK")
</pallas_src>

<mosaic_0001>
module attributes {stable_mosaic.version = 11 : i64} {
  func.func @kernel(%arg0: i32, %arg1: memref<32x8xf32, #tpu.memory_space<vmem>>, %arg2: memref<32x32xf32, #tpu.memory_space<vmem>>, %arg3: memref<8x64xf32, #tpu.memory_space<vmem>>, %arg4: memref<64x8xf32, #tpu.memory_space<vmem>>, %arg5: memref<1x64xf32, #tpu.memory_space<vmem>>, %arg6: memref<64x4xf32, #tpu.memory_space<vmem>>, %arg7: memref<4x2xf32, #tpu.memory_space<vmem>>, %arg8: memref<1x4xf32, #tpu.memory_space<vmem>>, %arg9: memref<32x4xf32, #tpu.memory_space<vmem>>) attributes {dimension_semantics = [#tpu.dimension_semantics<arbitrary>], iteration_bounds = array<i64: 1>, scalar_prefetch = 0 : i64, scratch_operands = 0 : i64, tpu.core_type = #tpu.core_type<tc>, window_params = [{pipeline_mode = #tpu.pipeline_mode<synchronous>, transform_indices = @transform_0, window_bounds = array<i64: 32, 8>}, {pipeline_mode = #tpu.pipeline_mode<synchronous>, transform_indices = @transform_1, window_bounds = array<i64: 32, 32>}, {pipeline_mode = #tpu.pipeline_mode<synchronous>, transform_indices = @transform_2, window_bounds = array<i64: 8, 64>}, {pipeline_mode = #tpu.pipeline_mode<synchronous>, transform_indices = @transform_3, window_bounds = array<i64: 64, 8>}, {pipeline_mode = #tpu.pipeline_mode<synchronous>, transform_indices = @transform_4, window_bounds = array<i64: 1, 64>}, {pipeline_mode = #tpu.pipeline_mode<synchronous>, transform_indices = @transform_5, window_bounds = array<i64: 64, 4>}, {pipeline_mode = #tpu.pipeline_mode<synchronous>, transform_indices = @transform_6, window_bounds = array<i64: 4, 2>}, {pipeline_mode = #tpu.pipeline_mode<synchronous>, transform_indices = @transform_7, window_bounds = array<i64: 1, 4>}, {pipeline_mode = #tpu.pipeline_mode<synchronous>, transform_indices = @transform_8, window_bounds = array<i64: 32, 4>}]} {
    %c0 = arith.constant 0 : index
    %c0_0 = arith.constant 0 : index
    %0 = vector.load %arg1[%c0, %c0_0] : memref<32x8xf32, #tpu.memory_space<vmem>>, vector<32x8xf32>
    %c0_1 = arith.constant 0 : index
    %c0_2 = arith.constant 0 : index
    %1 = vector.load %arg2[%c0_1, %c0_2] : memref<32x32xf32, #tpu.memory_space<vmem>>, vector<32x32xf32>
    %c0_3 = arith.constant 0 : index
    %c0_4 = arith.constant 0 : index
    %2 = vector.load %arg3[%c0_3, %c0_4] : memref<8x64xf32, #tpu.memory_space<vmem>>, vector<8x64xf32>
    %c0_5 = arith.constant 0 : index
    %c0_6 = arith.constant 0 : index
    %3 = vector.load %arg4[%c0_5, %c0_6] : memref<64x8xf32, #tpu.memory_space<vmem>>, vector<64x8xf32>
    %c0_7 = arith.constant 0 : index
    %c0_8 = arith.constant 0 : index
    %4 = vector.load %arg5[%c0_7, %c0_8] : memref<1x64xf32, #tpu.memory_space<vmem>>, vector<1x64xf32>
    %cst = arith.constant dense<0.000000e+00> : vector<32x64xf32>
    %5 = tpu.matmul %0, %2, %cst {dimension_numbers = #tpu.dot_dimension_numbers<[1], [0], [0], [1], [0, 0, 1, 1], [], []>} : vector<32x8xf32>, vector<8x64xf32>, vector<32x64xf32> -> vector<32x64xf32>
    %cst_9 = arith.constant dense<0.000000e+00> : vector<32x8xf32>
    %6 = tpu.matmul %5, %3, %cst_9 {dimension_numbers = #tpu.dot_dimension_numbers<[1], [0], [0], [1], [0, 0, 1, 1], [], []>} : vector<32x64xf32>, vector<64x8xf32>, vector<32x8xf32> -> vector<32x8xf32>
    %7 = vector.extract_strided_slice %6 {offsets = [0, 0], sizes = [32, 1], strides = [1, 1]} : vector<32x8xf32> to vector<32x1xf32>
    %8 = vector.extract_strided_slice %6 {offsets = [0, 4], sizes = [32, 1], strides = [1, 1]} : vector<32x8xf32> to vector<32x1xf32>
    %9 = tpu.transpose %7, [1, 0] : vector<32x1xf32> -> vector<1x32xf32>
    %10 = vector.broadcast %8 : vector<32x1xf32> to vector<32x32xf32>
    %11 = vector.broadcast %9 : vector<1x32xf32> to vector<32x32xf32>
    %12 = arith.addf %10, %11 : vector<32x32xf32>
    %cst_10 = arith.constant 0.000000e+00 : f32
    %13 = vector.broadcast %cst_10 : f32 to vector<32x32xf32>
    %14 = arith.cmpf ogt, %12, %13 : vector<32x32xf32>
    %cst_11 = arith.constant 2.000000e-01 : f32
    %15 = vector.broadcast %cst_11 : f32 to vector<32x32xf32>
    %16 = arith.mulf %15, %12 : vector<32x32xf32>
    %17 = arith.select %14, %12, %16 : vector<32x32xi1>, vector<32x32xf32>
    %18 = arith.addf %17, %1 : vector<32x32xf32>
    %cst_12 = arith.constant dense<0xFF800000> : vector<32xf32>
    %19 = vector.multi_reduction <maximumf>, %18, %cst_12 [1] : vector<32x32xf32> to vector<32xf32>
    %20 = vector.shape_cast %19 : vector<32xf32> to vector<32x1xf32>
    %21 = vector.broadcast %20 : vector<32x1xf32> to vector<32x32xf32>
    %22 = arith.subf %18, %21 : vector<32x32xf32>
    %23 = math.exp %22 : vector<32x32xf32>
    %cst_13 = arith.constant dense<0.000000e+00> : vector<32xf32>
    %24 = vector.multi_reduction <add>, %23, %cst_13 [1] : vector<32x32xf32> to vector<32xf32>
    %25 = vector.shape_cast %24 : vector<32xf32> to vector<32x1xf32>
    %cst_14 = arith.constant 9.99999968E-21 : f32
    %26 = vector.broadcast %cst_14 : f32 to vector<32x1xf32>
    %27 = arith.maximumf %25, %26 : vector<32x1xf32>
    %28 = tpu.reciprocal %27 {approx = true} : vector<32x1xf32> -> vector<32x1xf32>
    %29 = vector.broadcast %28 : vector<32x1xf32> to vector<32x32xf32>
    %30 = arith.mulf %23, %29 : vector<32x32xf32>
    %31 = vector.extract_strided_slice %5 {offsets = [0, 0], sizes = [32, 16], strides = [1, 1]} : vector<32x64xf32> to vector<32x16xf32>
    %cst_15 = arith.constant dense<0.000000e+00> : vector<32x16xf32>
    %32 = tpu.matmul %30, %31, %cst_15 {dimension_numbers = #tpu.dot_dimension_numbers<[1], [0], [0], [1], [0, 0, 1, 1], [], []>} : vector<32x32xf32>, vector<32x16xf32>, vector<32x16xf32> -> vector<32x16xf32>
    %33 = vector.extract_strided_slice %6 {offsets = [0, 1], sizes = [32, 1], strides = [1, 1]} : vector<32x8xf32> to vector<32x1xf32>
    %34 = vector.extract_strided_slice %6 {offsets = [0, 5], sizes = [32, 1], strides = [1, 1]} : vector<32x8xf32> to vector<32x1xf32>
    %35 = tpu.transpose %33, [1, 0] : vector<32x1xf32> -> vector<1x32xf32>
    %36 = vector.broadcast %34 : vector<32x1xf32> to vector<32x32xf32>
    %37 = vector.broadcast %35 : vector<1x32xf32> to vector<32x32xf32>
    %38 = arith.addf %36, %37 : vector<32x32xf32>
    %cst_16 = arith.constant 0.000000e+00 : f32
    %39 = vector.broadcast %cst_16 : f32 to vector<32x32xf32>
    %40 = arith.cmpf ogt, %38, %39 : vector<32x32xf32>
    %cst_17 = arith.constant 2.000000e-01 : f32
    %41 = vector.broadcast %cst_17 : f32 to vector<32x32xf32>
    %42 = arith.mulf %41, %38 : vector<32x32xf32>
    %43 = arith.select %40, %38, %42 : vector<32x32xi1>, vector<32x32xf32>
    %44 = arith.addf %43, %1 : vector<32x32xf32>
    %cst_18 = arith.constant dense<0xFF800000> : vector<32xf32>
    %45 = vector.multi_reduction <maximumf>, %44, %cst_18 [1] : vector<32x32xf32> to vector<32xf32>
    %46 = vector.shape_cast %45 : vector<32xf32> to vector<32x1xf32>
    %47 = vector.broadcast %46 : vector<32x1xf32> to vector<32x32xf32>
    %48 = arith.subf %44, %47 : vector<32x32xf32>
    %49 = math.exp %48 : vector<32x32xf32>
    %cst_19 = arith.constant dense<0.000000e+00> : vector<32xf32>
    %50 = vector.multi_reduction <add>, %49, %cst_19 [1] : vector<32x32xf32> to vector<32xf32>
    %51 = vector.shape_cast %50 : vector<32xf32> to vector<32x1xf32>
    %cst_20 = arith.constant 9.99999968E-21 : f32
    %52 = vector.broadcast %cst_20 : f32 to vector<32x1xf32>
    %53 = arith.maximumf %51, %52 : vector<32x1xf32>
    %54 = tpu.reciprocal %53 {approx = true} : vector<32x1xf32> -> vector<32x1xf32>
    %55 = vector.broadcast %54 : vector<32x1xf32> to vector<32x32xf32>
    %56 = arith.mulf %49, %55 : vector<32x32xf32>
    %57 = vector.extract_strided_slice %5 {offsets = [0, 16], sizes = [32, 16], strides = [1, 1]} : vector<32x64xf32> to vector<32x16xf32>
    %cst_21 = arith.constant dense<0.000000e+00> : vector<32x16xf32>
    %58 = tpu.matmul %56, %57, %cst_21 {dimension_numbers = #tpu.dot_dimension_numbers<[1], [0], [0], [1], [0, 0, 1, 1], [], []>} : vector<32x32xf32>, vector<32x16xf32>, vector<32x16xf32> -> vector<32x16xf32>
    %59 = vector.extract_strided_slice %6 {offsets = [0, 2], sizes = [32, 1], strides = [1, 1]} : vector<32x8xf32> to vector<32x1xf32>
    %60 = vector.extract_strided_slice %6 {offsets = [0, 6], sizes = [32, 1], strides = [1, 1]} : vector<32x8xf32> to vector<32x1xf32>
    %61 = tpu.transpose %59, [1, 0] : vector<32x1xf32> -> vector<1x32xf32>
    %62 = vector.broadcast %60 : vector<32x1xf32> to vector<32x32xf32>
    %63 = vector.broadcast %61 : vector<1x32xf32> to vector<32x32xf32>
    %64 = arith.addf %62, %63 : vector<32x32xf32>
    %cst_22 = arith.constant 0.000000e+00 : f32
    %65 = vector.broadcast %cst_22 : f32 to vector<32x32xf32>
    %66 = arith.cmpf ogt, %64, %65 : vector<32x32xf32>
    %cst_23 = arith.constant 2.000000e-01 : f32
    %67 = vector.broadcast %cst_23 : f32 to vector<32x32xf32>
    %68 = arith.mulf %67, %64 : vector<32x32xf32>
    %69 = arith.select %66, %64, %68 : vector<32x32xi1>, vector<32x32xf32>
    %70 = arith.addf %69, %1 : vector<32x32xf32>
    %cst_24 = arith.constant dense<0xFF800000> : vector<32xf32>
    %71 = vector.multi_reduction <maximumf>, %70, %cst_24 [1] : vector<32x32xf32> to vector<32xf32>
    %72 = vector.shape_cast %71 : vector<32xf32> to vector<32x1xf32>
    %73 = vector.broadcast %72 : vector<32x1xf32> to vector<32x32xf32>
    %74 = arith.subf %70, %73 : vector<32x32xf32>
    %75 = math.exp %74 : vector<32x32xf32>
    %cst_25 = arith.constant dense<0.000000e+00> : vector<32xf32>
    %76 = vector.multi_reduction <add>, %75, %cst_25 [1] : vector<32x32xf32> to vector<32xf32>
    %77 = vector.shape_cast %76 : vector<32xf32> to vector<32x1xf32>
    %cst_26 = arith.constant 9.99999968E-21 : f32
    %78 = vector.broadcast %cst_26 : f32 to vector<32x1xf32>
    %79 = arith.maximumf %77, %78 : vector<32x1xf32>
    %80 = tpu.reciprocal %79 {approx = true} : vector<32x1xf32> -> vector<32x1xf32>
    %81 = vector.broadcast %80 : vector<32x1xf32> to vector<32x32xf32>
    %82 = arith.mulf %75, %81 : vector<32x32xf32>
    %83 = vector.extract_strided_slice %5 {offsets = [0, 32], sizes = [32, 16], strides = [1, 1]} : vector<32x64xf32> to vector<32x16xf32>
    %cst_27 = arith.constant dense<0.000000e+00> : vector<32x16xf32>
    %84 = tpu.matmul %82, %83, %cst_27 {dimension_numbers = #tpu.dot_dimension_numbers<[1], [0], [0], [1], [0, 0, 1, 1], [], []>} : vector<32x32xf32>, vector<32x16xf32>, vector<32x16xf32> -> vector<32x16xf32>
    %85 = vector.extract_strided_slice %6 {offsets = [0, 3], sizes = [32, 1], strides = [1, 1]} : vector<32x8xf32> to vector<32x1xf32>
    %86 = vector.extract_strided_slice %6 {offsets = [0, 7], sizes = [32, 1], strides = [1, 1]} : vector<32x8xf32> to vector<32x1xf32>
    %87 = tpu.transpose %85, [1, 0] : vector<32x1xf32> -> vector<1x32xf32>
    %88 = vector.broadcast %86 : vector<32x1xf32> to vector<32x32xf32>
    %89 = vector.broadcast %87 : vector<1x32xf32> to vector<32x32xf32>
    %90 = arith.addf %88, %89 : vector<32x32xf32>
    %cst_28 = arith.constant 0.000000e+00 : f32
    %91 = vector.broadcast %cst_28 : f32 to vector<32x32xf32>
    %92 = arith.cmpf ogt, %90, %91 : vector<32x32xf32>
    %cst_29 = arith.constant 2.000000e-01 : f32
    %93 = vector.broadcast %cst_29 : f32 to vector<32x32xf32>
    %94 = arith.mulf %93, %90 : vector<32x32xf32>
    %95 = arith.select %92, %90, %94 : vector<32x32xi1>, vector<32x32xf32>
    %96 = arith.addf %95, %1 : vector<32x32xf32>
    %cst_30 = arith.constant dense<0xFF800000> : vector<32xf32>
    %97 = vector.multi_reduction <maximumf>, %96, %cst_30 [1] : vector<32x32xf32> to vector<32xf32>
    %98 = vector.shape_cast %97 : vector<32xf32> to vector<32x1xf32>
    %99 = vector.broadcast %98 : vector<32x1xf32> to vector<32x32xf32>
    %100 = arith.subf %96, %99 : vector<32x32xf32>
    %101 = math.exp %100 : vector<32x32xf32>
    %cst_31 = arith.constant dense<0.000000e+00> : vector<32xf32>
    %102 = vector.multi_reduction <add>, %101, %cst_31 [1] : vector<32x32xf32> to vector<32xf32>
    %103 = vector.shape_cast %102 : vector<32xf32> to vector<32x1xf32>
    %cst_32 = arith.constant 9.99999968E-21 : f32
    %104 = vector.broadcast %cst_32 : f32 to vector<32x1xf32>
    %105 = arith.maximumf %103, %104 : vector<32x1xf32>
    %106 = tpu.reciprocal %105 {approx = true} : vector<32x1xf32> -> vector<32x1xf32>
    %107 = vector.broadcast %106 : vector<32x1xf32> to vector<32x32xf32>
    %108 = arith.mulf %101, %107 : vector<32x32xf32>
    %109 = vector.extract_strided_slice %5 {offsets = [0, 48], sizes = [32, 16], strides = [1, 1]} : vector<32x64xf32> to vector<32x16xf32>
    %cst_33 = arith.constant dense<0.000000e+00> : vector<32x16xf32>
    %110 = tpu.matmul %108, %109, %cst_33 {dimension_numbers = #tpu.dot_dimension_numbers<[1], [0], [0], [1], [0, 0, 1, 1], [], []>} : vector<32x32xf32>, vector<32x16xf32>, vector<32x16xf32> -> vector<32x16xf32>
    %111 = tpu.concatenate %32, %58, %84, %110 in 1 : vector<32x16xf32>, vector<32x16xf32>, vector<32x16xf32>, vector<32x16xf32> -> vector<32x64xf32>
    %112 = vector.broadcast %4 : vector<1x64xf32> to vector<32x64xf32>
    %113 = arith.addf %111, %112 : vector<32x64xf32>
    %cst_34 = arith.constant 0.000000e+00 : f32
    %114 = vector.broadcast %cst_34 : f32 to vector<32x64xf32>
    %115 = arith.cmpf ogt, %113, %114 : vector<32x64xf32>
    %116 = math.exp %113 : vector<32x64xf32>
    %cst_35 = arith.constant 1.000000e+00 : f32
    %117 = vector.broadcast %cst_35 : f32 to vector<32x64xf32>
    %118 = arith.subf %116, %117 : vector<32x64xf32>
    %119 = arith.select %115, %113, %118 : vector<32x64xi1>, vector<32x64xf32>
    %c0_36 = arith.constant 0 : index
    %c0_37 = arith.constant 0 : index
    %120 = vector.load %arg6[%c0_36, %c0_37] : memref<64x4xf32, #tpu.memory_space<vmem>>, vector<64x4xf32>
    %c0_38 = arith.constant 0 : index
    %c0_39 = arith.constant 0 : index
    %121 = vector.load %arg7[%c0_38, %c0_39] : memref<4x2xf32, #tpu.memory_space<vmem>>, vector<4x2xf32>
    %c0_40 = arith.constant 0 : index
    %c0_41 = arith.constant 0 : index
    %122 = vector.load %arg8[%c0_40, %c0_41] : memref<1x4xf32, #tpu.memory_space<vmem>>, vector<1x4xf32>
    %cst_42 = arith.constant dense<0.000000e+00> : vector<32x4xf32>
    %123 = tpu.matmul %119, %120, %cst_42 {dimension_numbers = #tpu.dot_dimension_numbers<[1], [0], [0], [1], [0, 0, 1, 1], [], []>} : vector<32x64xf32>, vector<64x4xf32>, vector<32x4xf32> -> vector<32x4xf32>
    %cst_43 = arith.constant dense<0.000000e+00> : vector<32x2xf32>
    %124 = tpu.matmul %123, %121, %cst_43 {dimension_numbers = #tpu.dot_dimension_numbers<[1], [0], [0], [1], [0, 0, 1, 1], [], []>} : vector<32x4xf32>, vector<4x2xf32>, vector<32x2xf32> -> vector<32x2xf32>
    %125 = vector.extract_strided_slice %124 {offsets = [0, 0], sizes = [32, 1], strides = [1, 1]} : vector<32x2xf32> to vector<32x1xf32>
    %126 = vector.extract_strided_slice %124 {offsets = [0, 1], sizes = [32, 1], strides = [1, 1]} : vector<32x2xf32> to vector<32x1xf32>
    %127 = tpu.transpose %125, [1, 0] : vector<32x1xf32> -> vector<1x32xf32>
    %128 = vector.broadcast %126 : vector<32x1xf32> to vector<32x32xf32>
    %129 = vector.broadcast %127 : vector<1x32xf32> to vector<32x32xf32>
    %130 = arith.addf %128, %129 : vector<32x32xf32>
    %cst_44 = arith.constant 0.000000e+00 : f32
    %131 = vector.broadcast %cst_44 : f32 to vector<32x32xf32>
    %132 = arith.cmpf ogt, %130, %131 : vector<32x32xf32>
    %cst_45 = arith.constant 2.000000e-01 : f32
    %133 = vector.broadcast %cst_45 : f32 to vector<32x32xf32>
    %134 = arith.mulf %133, %130 : vector<32x32xf32>
    %135 = arith.select %132, %130, %134 : vector<32x32xi1>, vector<32x32xf32>
    %136 = arith.addf %135, %1 : vector<32x32xf32>
    %cst_46 = arith.constant dense<0xFF800000> : vector<32xf32>
    %137 = vector.multi_reduction <maximumf>, %136, %cst_46 [1] : vector<32x32xf32> to vector<32xf32>
    %138 = vector.shape_cast %137 : vector<32xf32> to vector<32x1xf32>
    %139 = vector.broadcast %138 : vector<32x1xf32> to vector<32x32xf32>
    %140 = arith.subf %136, %139 : vector<32x32xf32>
    %141 = math.exp %140 : vector<32x32xf32>
    %cst_47 = arith.constant dense<0.000000e+00> : vector<32xf32>
    %142 = vector.multi_reduction <add>, %141, %cst_47 [1] : vector<32x32xf32> to vector<32xf32>
    %143 = vector.shape_cast %142 : vector<32xf32> to vector<32x1xf32>
    %cst_48 = arith.constant 9.99999968E-21 : f32
    %144 = vector.broadcast %cst_48 : f32 to vector<32x1xf32>
    %145 = arith.maximumf %143, %144 : vector<32x1xf32>
    %146 = tpu.reciprocal %145 {approx = true} : vector<32x1xf32> -> vector<32x1xf32>
    %147 = vector.broadcast %146 : vector<32x1xf32> to vector<32x32xf32>
    %148 = arith.mulf %141, %147 : vector<32x32xf32>
    %cst_49 = arith.constant dense<0.000000e+00> : vector<32x4xf32>
    %149 = tpu.matmul %148, %123, %cst_49 {dimension_numbers = #tpu.dot_dimension_numbers<[1], [0], [0], [1], [0, 0, 1, 1], [], []>} : vector<32x32xf32>, vector<32x4xf32>, vector<32x4xf32> -> vector<32x4xf32>
    %cst_50 = arith.constant 1.000000e+00 : f32
    %150 = vector.broadcast %cst_50 : f32 to vector<32x4xf32>
    %151 = arith.mulf %149, %150 : vector<32x4xf32>
    %152 = vector.broadcast %122 : vector<1x4xf32> to vector<32x4xf32>
    %153 = arith.addf %151, %152 : vector<32x4xf32>
    %c0_51 = arith.constant 0 : index
    %c0_52 = arith.constant 0 : index
    %154 = vector.load %arg9[%c0_51, %c0_52] : memref<32x4xf32, #tpu.memory_space<vmem>>, vector<32x4xf32>
    tpu.vector_store %arg9[%c0_51, %c0_52], %153 {strides = array<i32>} : memref<32x4xf32, #tpu.memory_space<vmem>>, vector<32x4xf32>,
    return
  }
  func.func @transform_0(%arg0: i32) -> (i32, i32) {
    %c0_i32 = arith.constant 0 : i32
    %c0_i32_0 = arith.constant 0 : i32
    %c0_i32_1 = arith.constant 0 : i32
    return %c0_i32, %c0_i32_0 : i32, i32
  }
  func.func @transform_1(%arg0: i32) -> (i32, i32) {
    %c0_i32 = arith.constant 0 : i32
    %c0_i32_0 = arith.constant 0 : i32
    %c0_i32_1 = arith.constant 0 : i32
    return %c0_i32, %c0_i32_0 : i32, i32
  }
  func.func @transform_2(%arg0: i32) -> (i32, i32) {
    %c0_i32 = arith.constant 0 : i32
    %c0_i32_0 = arith.constant 0 : i32
    %c0_i32_1 = arith.constant 0 : i32
    return %c0_i32, %c0_i32_0 : i32, i32
  }
  func.func @transform_3(%arg0: i32) -> (i32, i32) {
    %c0_i32 = arith.constant 0 : i32
    %c0_i32_0 = arith.constant 0 : i32
    %c0_i32_1 = arith.constant 0 : i32
    return %c0_i32, %c0_i32_0 : i32, i32
  }
  func.func @transform_4(%arg0: i32) -> (i32, i32) {
    %c0_i32 = arith.constant 0 : i32
    %c0_i32_0 = arith.constant 0 : i32
    %c0_i32_1 = arith.constant 0 : i32
    return %c0_i32, %c0_i32_0 : i32, i32
  }
  func.func @transform_5(%arg0: i32) -> (i32, i32) {
    %c0_i32 = arith.constant 0 : i32
    %c0_i32_0 = arith.constant 0 : i32
    %c0_i32_1 = arith.constant 0 : i32
    return %c0_i32, %c0_i32_0 : i32, i32
  }
  func.func @transform_6(%arg0: i32) -> (i32, i32) {
    %c0_i32 = arith.constant 0 : i32
    %c0_i32_0 = arith.constant 0 : i32
    %c0_i32_1 = arith.constant 0 : i32
    return %c0_i32, %c0_i32_0 : i32, i32
  }
  func.func @transform_7(%arg0: i32) -> (i32, i32) {
    %c0_i32 = arith.constant 0 : i32
    %c0_i32_0 = arith.constant 0 : i32
    %c0_i32_1 = arith.constant 0 : i32
    return %c0_i32, %c0_i32_0 : i32, i32
  }
  func.func @transform_8(%arg0: i32) -> (i32, i32) {
    %c0_i32 = arith.constant 0 : i32
    %c0_i32_0 = arith.constant 0 : i32
    %c0_i32_1 = arith.constant 0 : i32
    return %c0_i32, %c0_i32_0 : i32, i32
  }
}

</mosaic_0001>

<bundles_post_ra>
// kernel: tpu_custom_call.1
= control target key start
LH: loop header
LB: loop body
LE: loop exit
PB: predicated region body
PF: predicated region fallthrough
CT: control target
= control target key end

     0   :  { %vm47_vm0 = vcmask 64512   ;;  %vm145_vm1 = vcmask 523264   ;;  %s2197_s29 = smov 112   ;;  %v2198_v25 = vmov 4   ;;  %v2199_v26 = vmov 5   ;;  %s2201_s30 = smov 127   ;;  %s2685_s2 = inlined_call_operand.vmem [shape: f32[8,64], index: 2, kind: input, shape index: {}]   ;;  %s2686_s0 = inlined_call_operand.vmem [shape: f32[32,8], index: 0, kind: input, shape index: {}]   ;;  %s2687_s3 = inlined_call_operand.vmem [shape: f32[64,8], index: 3, kind: input, shape index: {}]   ;;  %s2688_s1 = inlined_call_operand.vmem [shape: f32[32,32], index: 1, kind: input, shape index: {}]   ;;  %s2689_s5 = inlined_call_operand.vmem [shape: f32[64,4], index: 5, kind: input, shape index: {}]   ;;  %s2690_s6 = inlined_call_operand.vmem [shape: f32[4,2], index: 6, kind: input, shape index: {}]   ;;  %s2691_s4 = inlined_call_operand.vmem [shape: f32[1,64], index: 4, kind: input, shape index: {}]   ;;  %s2692_s7 = inlined_call_operand.vmem [shape: f32[1,4], index: 7, kind: input, shape index: {}]   ;;  %s2693_s8 = inlined_call_operand.vmem [shape: f32[32,4], index: 8, kind: output, shape index: {}]  }
   0x1   :  { %v37_v0 = vld [vmem:[%s2685_s2] sm:$0xff]  ;;  %v30_v2 = vld [vmem:[%s2686_s0 + $0x8] sm:$0xff]  ;;  %v31_v3 = vld [vmem:[%s2686_s0 + $0x10] sm:$0xff]  ;;  %2063 = vset.pattern.permute.xlu1 %v2198_v25  ;;  %2064 = vset.pattern.permute.xlu0 %v2199_v26  ;;  %s2202_s9 = smov 126   ;;  %v2203_v35 = vmov 6   ;;  %v2204_v36 = vmov 7   ;;  %v295_v61 = vlaneseq }
   0x2   :  { %v29_v1 = vld [vmem:[%s2686_s0] sm:$0xff]  ;;  %1841 = vmatprep.subr.mxu0 %v37_v0  ;;  %v39_v5 = vld [vmem:[%s2687_s3 + $0x8] sm:$0xff]  ;;  %v40_v6 = vld [vmem:[%s2687_s3 + $0x10] sm:$0xff]  ;;  %vm319_vm4 = vcmask 261120   ;;  %s2205_s17 = smov 96   ;;  %s2206_s18 = smov 80  }
   0x3   :  { %1843 = vmatprep.mubr.msk.f32.mxu0 %vm47_vm0, %v29_v1  ;;  %v38_v4 = vld [vmem:[%s2687_s3] sm:$0xff]  ;;  %1842 = vmatpush3.msra.mxu0 %v37_v0  ;;  %v41_v7 = vld [vmem:[%s2687_s3 + $0x18] sm:$0xff]  ;;  %v43_v12 = vld [vmem:[%s2687_s3 + $0x28] sm:$0xff]  ;;  %v296_v62 = vshrl.u32 %v295_v61, 7  ;;  %s2207_s19 = smov 16   ;;  %s2208_s20 = smov 32  }
   0x4   :  { %1844 = vmatmul.mubr.msk.f32.vlgmr.msra.gmra.mrb[0].mxu0 %vm47_vm0, %v30_v2  ;;  %v1971_v8 = vpack.c.bf16 %v39_v5, %v38_v4  ;;  %v1975_v9 = vpack.c.bf16 %v41_v7, %v40_v6  ;;  %v32_v10 = vld [vmem:[%s2686_s0 + $0x18] sm:$0xff]  ;;  %v42_v11 = vld [vmem:[%s2687_s3 + $0x20] sm:$0xff]  ;;  %v44_v14 = vld [vmem:[%s2687_s3 + $0x30] sm:$0xff]  ;;  %s2209_s0 = smov 48  }
   0x5   :  { %1846 = vmatprep.mubr.msk.f32.mxu0 %vm47_vm0, %v31_v3  ;;  %v1979_v13 = vpack.c.bf16 %v43_v12, %v42_v11  ;;  %v45_v15 = vld [vmem:[%s2687_s3 + $0x38] sm:$0xff]  ;;  %s2200_s3 = smov 125   ;;  %v2340_v0 = vsub.s32 0, %v296_v62  ;;  %v2346_v7 = vld [vmem:[%s2688_s1] sm:$0xff] }
   0x6   :  { %1972 = vmatprep.subr.bf16.mxu1 %v1971_v8  ;;  %v1983_v16 = vpack.c.bf16 %v45_v15, %v44_v14  ;;  %v2354_v12 = vld [vmem:[%s2688_s1 + $0x18] sm:$0xff] }
   0x7   :  { %1974 = vmatpush3.bf16.msra.mxu1 %v1971_v8 }
   0x8   :  { %1847 = vmatmul.mubr.msk.f32.gmra.mrb[2].mxu0 %vm47_vm0, %v32_v10  ;;  %1976 = vmatprep.subr.bf16.mxu1 %v1975_v9 }
   0xb   :  { %1978 = vmatpush3.bf16.msra.mxu1 %v1975_v9 }
   0xc   :  { %1980 = vmatprep.subr.bf16.mxu1 %v1979_v13 }
   0xf   :  { %1982 = vmatpush3.bf16.msra.mxu1 %v1979_v13 }
  0x10   :  { %1984 = vmatprep.subr.bf16.mxu1 %v1983_v16 }
  0x13   :  { %1986 = vmatpush3.bf16.msra.mxu1 %v1983_v16 }
  0xd7   :  { %v1845_v17 = vpop.f32.mrb[0].mxu0 }
  0xd8   :  { %v126_v18 = vpop.f32.mrb[1].mxu0 }
  0xd9   :  { %1865 = vmatprep.mubr.msk.f32.mxu1 %vm145_vm1, %v126_v18  ;;  %v2300_v19 = vpack.i.bf16 %v1845_v17, %v126_v18  ;;  %v1987_v20 = vpack.c.bf16 %v1845_v17, %v126_v18 }
  0xda   :  { %1866 = vmatmul.mubr.msk.f32.vlgmr.msra.gmra.mrb[0].mxu1 %vm145_vm1, %v1845_v17  ;;  %v2364_v17 = vld [vmem:[%s2688_s1 + $0x10] sm:$0xff] }
  0xdb   :  { %2059 = vrot.lane.b32.xlu1 %v2300_v19, %s2197_s29  ;;  %1988 = vmatprep.subr.bf16.mxu0 %v1987_v20  ;;  %v1848_v21 = vpop.f32.mrb[2].mxu0 }
  0xdc   :  { %1990 = vmatpush3.bf16.msra.mxu0 %v1987_v20  ;;  %v136_v22 = vpop.f32.mrb[3].mxu0 }
  0xdd   :  { %1868 = vmatprep.mubr.msk.f32.mxu1 %vm145_vm1, %v136_v22  ;;  %v1991_v23 = vpack.c.bf16 %v1848_v21, %v136_v22  ;;  %v2306_v24 = vpack.i.bf16 %v1848_v21, %v136_v22 }
  0xde   :  { %1869 = vmatmul.mubr.msk.f32.gmra.mrb[2].mxu1 %vm145_vm1, %v1848_v21 }
  0xdf   :  { %1992 = vmatprep.subr.bf16.mxu0 %v1991_v23 }
  0xe0   :  { %1994 = vmatpush3.bf16.msra.mxu0 %v1991_v23 }
 0x14d   :  { %v2060_v27 = vpop.permute.xlu1 %2059 }
 0x14e   :  { %v2062_v28 = vunpack.i.h.bf16 %v2060_v27  ;;  %v2061_v29 = vunpack.i.l.bf16 %v2060_v27 }
 0x150   :  { %v2309_v30 = vpack.c.bf16 %v2062_v28, %v2061_v29 }
 0x152   :  { %1996 = vmatprep.subr.bf16.mxu0 %v2309_v30 }
 0x1ad   :  { %v1867_v31 = vpop.f32.mrb[0].mxu1 }
 0x1ae   :  { %949 = vrot.lane.b32.xlu1 %v1867_v31, %s2200_s3  ;;  %467 = vrot.lane.b32.xlu0 %v1867_v31, %s2201_s30  ;;  %v224_v32 = vpop.f32.mrb[1].mxu1 }
 0x1b1   :  { %v1870_v33 = vpop.f32.mrb[2].mxu1 }
 0x1b2   :  { %282 = vperm.xlu1 %2063, %v1867_v31   ;;  %708 = vrot.lane.b32.xlu0 %v1867_v31, %s2202_s9  ;;  %v234_v34 = vpop.f32.mrb[3].mxu1 }
 0x1b6   :  { %2065 = vset.pattern.permute.xlu1 %v2203_v35  ;;  %514 = vperm.xlu0 %2064, %v1867_v31  }
 0x1b7   :  { %755 = vperm.xlu1 %2065, %v1867_v31  }
 0x1ba   :  { %2066 = vset.pattern.permute.xlu0 %v2204_v36 }
 0x1bb   :  { %996 = vperm.xlu0 %2066, %v1867_v31   ;;  %947 = vrot.lane.b32.xlu1 %v224_v32, %s2200_s3 }
 0x1bc   :  { %2068 = vset.pattern.permute.xlu1 %v2199_v26 }
 0x1bf   :  { %510 = vperm.xlu1 %2068, %v224_v32   ;;  %465 = vrot.lane.b32.xlu0 %v224_v32, %s2201_s30 }
 0x1c0   :  { %2067 = vset.pattern.permute.xlu0 %v2198_v25 }
 0x1c3   :  { %2070 = vset.pattern.permute.xlu1 %v2204_v36  ;;  %706 = vrot.lane.b32.xlu0 %v224_v32, %s2202_s9 }
 0x1c4   :  { %992 = vperm.xlu1 %2070, %v224_v32  }
 0x1c7   :  { %277 = vperm.xlu0 %2067, %v224_v32  }
 0x1c8   :  { %471 = vrot.lane.b32.xlu1 %v1870_v33, %s2201_s30 }
 0x1c9   :  { %2072 = vset.pattern.permute.xlu1 %v2199_v26 }
 0x1cb   :  { %2069 = vset.pattern.permute.xlu0 %v2203_v35 }
 0x1cc   :  { %751 = vperm.xlu0 %2069, %v224_v32   ;;  %953 = vrot.lane.b32.xlu1 %v1870_v33, %s2200_s3 }
 0x1d0   :  { %712 = vrot.lane.b32.xlu0 %v1870_v33, %s2202_s9  ;;  %522 = vperm.xlu1 %2072, %v1870_v33  }
 0x1d1   :  { %2071 = vset.pattern.permute.xlu0 %v2198_v25 }
 0x1d4   :  { %292 = vperm.xlu0 %2071, %v1870_v33   ;;  %2073 = vset.pattern.permute.xlu1 %v2203_v35 }
 0x1d5   :  { %763 = vperm.xlu1 %2073, %v1870_v33  }
 0x1d8   :  { %710 = vrot.lane.b32.xlu0 %v234_v34, %s2202_s9 }
 0x1d9   :  { %2074 = vset.pattern.permute.xlu1 %v2204_v36  ;;  %2078 = vset.pattern.permute.xlu0 %v2204_v36 }
 0x1da   :  { %1004 = vperm.xlu1 %2074, %v1870_v33  }
 0x1dc   :  { %1000 = vperm.xlu0 %2078, %v234_v34  }
 0x1de   :  { %469 = vrot.lane.b32.xlu1 %v234_v34, %s2201_s30 }
 0x1df   :  { %2075 = vset.pattern.permute.xlu1 %v2198_v25 }
 0x1e2   :  { %951 = vrot.lane.b32.xlu1 %v234_v34, %s2200_s3 }
 0x1e6   :  { %287 = vperm.xlu1 %2075, %v234_v34  }
 0x1ea   :  { %2076 = vset.pattern.permute.xlu1 %v2199_v26  ;;  %v2376_v26 = vld [vmem:[%s2688_s1 + $0x8] sm:$0xff] }
 0x1eb   :  { %518 = vperm.xlu1 %2076, %v234_v34  }
 0x1ef   :  { %2077 = vset.pattern.permute.xlu1 %v2203_v35 }
 0x1f0   :  { %759 = vperm.xlu1 %2077, %v234_v34  }
 0x1fa   :  { %243 = vxpose.xlu0.b32.start [1/4] (short) (narrow) %v224_v32, 8 }
 0x1fe   :  { %244 = vxpose.xlu0.b32.cont [2/4] (short) (narrow) %v1867_v31, 8 }
 0x202   :  { %245 = vxpose.xlu0.b32.cont [3/4] (short) (narrow) %v234_v34, 8 }
 0x206   :  { %246 = vxpose.xlu0.b32.end [4/4] (short) (narrow) %v1870_v33, 8 }
 0x220   :  { %v468_v37 = vpop.permute.xlu0 %467  ;;  %v950_v38 = vpop.permute.xlu1 %949 }
 0x224   :  { %v709_v39 = vpop.permute.xlu0 %708 }
 0x231   :  { %v283_v40 = vpop.permute.xlu1 %282 }
 0x235   :  { %v2320_v41 = vpop.permute.xlu0 %514 }
 0x236   :  { %v2322_v42 = vpop.permute.xlu1 %755 }
 0x23a   :  { %v2324_v43 = vpop.permute.xlu0 %996  ;;  %v948_v44 = vpop.permute.xlu1 %947 }
 0x23e   :  { %v2326_v45 = vpop.permute.xlu1 %510  ;;  %v466_v46 = vpop.permute.xlu0 %465 }
 0x23f   :  { %477 = vxpose.xlu1.b32.start [1/4] (short) (narrow) %v466_v46, 8 }
 0x242   :  { %v707_v47 = vpop.permute.xlu0 %706 }
 0x243   :  { %v2328_v48 = vpop.permute.xlu1 %992  ;;  %718 = vxpose.xlu0.b32.start [1/4] (short) (narrow) %v707_v47, 8  ;;  %478 = vxpose.xlu1.b32.cont [2/4] (short) (narrow) %v468_v37, 8 }
 0x246   :  { %v278_v49 = vpop.permute.xlu0 %277 }
 0x247   :  { %v472_v50 = vpop.permute.xlu1 %471  ;;  %719 = vxpose.xlu0.b32.cont [2/4] (short) (narrow) %v709_v39, 8 }
 0x24b   :  { %v2330_v51 = vpop.permute.xlu0 %751  ;;  %v954_v52 = vpop.permute.xlu1 %953 }
 0x24f   :  { %v713_v53 = vpop.permute.xlu0 %712  ;;  %v2332_v54 = vpop.permute.xlu1 %522 }
 0x253   :  { %v293_v55 = vpop.permute.xlu0 %292 }
 0x254   :  { %v2334_v56 = vpop.permute.xlu1 %763 }
 0x257   :  { %v711_v57 = vpop.permute.xlu0 %710 }
 0x258   :  { %720 = vxpose.xlu0.b32.cont [3/4] (short) (narrow) %v711_v57, 8 }
 0x259   :  { %v2336_v58 = vpop.permute.xlu1 %1004 }
 0x25b   :  { %v2338_v63 = vpop.permute.xlu0 %1000 }
 0x25c   :  { %721 = vxpose.xlu0.b32.end [4/4] (short) (narrow) %v713_v53, 8 }
 0x25d   :  { %v470_v59 = vpop.permute.xlu1 %469 }
 0x25e   :  { %479 = vxpose.xlu1.b32.cont [3/4] (short) (narrow) %v470_v59, 8 }
 0x261   :  { %v952_v60 = vpop.permute.xlu1 %951 }
 0x262   :  { %480 = vxpose.xlu1.b32.end [4/4] (short) (narrow) %v472_v50, 8 }
 0x265   :  { %v288_v6 = vpop.permute.xlu1 %287 }
 0x266   :  { %959 = vxpose.xlu1.b32.start [1/4] (short) (narrow) %v948_v44, 8 }
 0x26a   :  { %960 = vxpose.xlu1.b32.cont [2/4] (short) (narrow) %v950_v38, 8  ;;  %v519_v31 = vpop.permute.xlu1 %518 }
 0x26e   :  { %961 = vxpose.xlu1.b32.cont [3/4] (short) (narrow) %v952_v60, 8 }
 0x26f   :  { %v760_v33 = vpop.permute.xlu1 %759 }
 0x272   :  { %962 = vxpose.xlu1.b32.end [4/4] (short) (narrow) %v954_v52, 8 }
 0x27a   :  { %v259_v1 = vpop.trf.xlu0 }
 0x27b   :  { %v298_v2 = vrot.slane %v259_v1, %v2340_v0 }
 0x27d   :  { %v299_v3 = vadd.f32 %v298_v2, %v278_v49  ;;  %v302_v4 = vadd.f32 %v298_v2, %v293_v55  ;;  %v301_v10 = vadd.f32 %v298_v2, %v288_v6  ;;  %v300_v20 = vadd.f32 %v298_v2, %v283_v40 }
 0x27f   :  { %vm303_vm2 = vcmp.gt.f32.partialorder %v299_v3, 0.0  ;;  %v307_v5 = vmul.f32 0.2, %v299_v3  ;;  %v310_v9 = vmul.f32 0.2, %v302_v4  ;;  %vm306_vm3 = vcmp.gt.f32.partialorder %v302_v4, 0.0 }
 0x280   :  { %v309_v14 = vmul.f32 0.2, %v301_v10  ;;  %vm305_vm5 = vcmp.gt.f32.partialorder %v301_v10, 0.0  ;;  %v308_v23 = vmul.f32 0.2, %v300_v20  ;;  %vm304_vm6 = vcmp.gt.f32.partialorder %v300_v20, 0.0 }
 0x281   :  { %v311_v8 = vsel %vm303_vm2, %v299_v3, %v307_v5  ;;  %v314_v13 = vsel %vm306_vm3, %v302_v4, %v310_v9 }
 0x282   :  { %v2349_v11 = vadd.f32 %v311_v8, %v2346_v7  ;;  %v2359_v16 = vadd.f32 %v314_v13, %v2354_v12  ;;  %v313_v18 = vsel %vm305_vm5, %v301_v10, %v309_v14  ;;  %v312_v27 = vsel %vm304_vm6, %v300_v20, %v308_v23 }
 0x283   :  { %v2369_v22 = vadd.f32 %v313_v18, %v2364_v17  ;;  %v2379_v28 = vadd.f32 %v312_v27, %v2376_v26  ;;  %vm1400_vm5 = vcmask 1043456   ;;  %vm1236_vm6 = vcmask 130048  }
 0x284   :  { %v320_v15 = vsel %vm319_vm4, %v2349_v11, -inf  ;;  %v329_v21 = vsel %vm319_vm4, %v2359_v16, -inf }
 0x285   :  { %v326_v25 = vsel %vm319_vm4, %v2369_v22, -inf  ;;  %v323_v29 = vsel %vm319_vm4, %v2379_v28, -inf }
 0x289   :  { %321 = vmax.xlane.f32.xlu0 %v320_v15 }
 0x28d   :  { %330 = vmax.xlane.f32.xlu0 %v329_v21 }
 0x291   :  { %327 = vmax.xlane.f32.xlu0 %v326_v25 }
 0x299   :  { %324 = vmax.xlane.f32.xlu1 %v323_v29 }
 0x2d0   :  { %v734_v32 = vpop.trf.xlu0 }
 0x2d1   :  { %v769_v34 = vrot.slane %v734_v32, %v2340_v0 }
 0x2d3   :  { %v771_v36 = vadd.f32 %v769_v34, %v2322_v42  ;;  %v770_v38 = vadd.f32 %v769_v34, %v2330_v51  ;;  %v773_v3 = vadd.f32 %v769_v34, %v2334_v56  ;;  %v772_v4 = vadd.f32 %v769_v34, %v760_v33 }
 0x2d5   :  { %vm775_vm7 = vcmp.gt.f32.partialorder %v771_v36, 0.0  ;;  %v779_v47 = vmul.f32 0.2, %v771_v36  ;;  %vm774_vm12 = vcmp.gt.f32.partialorder %v770_v38, 0.0  ;;  %v778_v51 = vmul.f32 0.2, %v770_v38 }
 0x2d6   :  { %v493_v35 = vpop.trf.xlu1  ;;  %vm777_vm13 = vcmp.gt.f32.partialorder %v773_v3, 0.0  ;;  %v781_v15 = vmul.f32 0.2, %v773_v3  ;;  %v780_v18 = vmul.f32 0.2, %v772_v4  ;;  %vm776_vm14 = vcmp.gt.f32.partialorder %v772_v4, 0.0 }
 0x2d7   :  { %v528_v37 = vrot.slane %v493_v35, %v2340_v0  ;;  %v783_v1 = vsel %vm775_vm7, %v771_v36, %v779_v47  ;;  %v782_v2 = vsel %vm774_vm12, %v770_v38, %v778_v51  ;;  %vm1245_vm7 = vcmask 392192  }
 0x2d8   :  { %v2413_v8 = vadd.f32 %v783_v1, %v2376_v26  ;;  %v2416_v9 = vadd.f32 %v782_v2, %v2346_v7  ;;  %v784_v32 = vsel %vm776_vm14, %v772_v4, %v780_v18  ;;  %vm1387_vm12 = vcmask 31744  }
 0x2d9   :  { %v530_v39 = vadd.f32 %v528_v37, %v2320_v41  ;;  %v529_v40 = vadd.f32 %v528_v37, %v2326_v45  ;;  %v532_v44 = vadd.f32 %v528_v37, %v2332_v54  ;;  %v531_v46 = vadd.f32 %v528_v37, %v519_v31 }
 0x2da   :  { %v793_v56 = vsel %vm319_vm4, %v2413_v8, -inf  ;;  %v790_v14 = vsel %vm319_vm4, %v2416_v9, -inf  ;;  %v785_v31 = vsel %vm777_vm13, %v773_v3, %v781_v15  ;;  %v2442_v38 = vadd.f32 %v784_v32, %v2364_v17 }
 0x2db   :  { %vm534_vm8 = vcmp.gt.f32.partialorder %v530_v39, 0.0  ;;  %v538_v49 = vmul.f32 0.2, %v530_v39  ;;  %vm533_vm9 = vcmp.gt.f32.partialorder %v529_v40, 0.0  ;;  %v537_v50 = vmul.f32 0.2, %v529_v40 }
 0x2dc   :  { %vm536_vm10 = vcmp.gt.f32.partialorder %v532_v44, 0.0  ;;  %v540_v52 = vmul.f32 0.2, %v532_v44  ;;  %vm535_vm11 = vcmp.gt.f32.partialorder %v531_v46, 0.0  ;;  %v539_v42 = vmul.f32 0.2, %v531_v46 }
 0x2dd   :  { %v542_v53 = vsel %vm534_vm8, %v530_v39, %v538_v49  ;;  %v541_v55 = vsel %vm533_vm9, %v529_v40, %v537_v50  ;;  %v2439_v37 = vadd.f32 %v785_v31, %v2354_v12 }
 0x2de   :  { %v2391_v41 = vadd.f32 %v542_v53, %v2376_v26  ;;  %v2394_v45 = vadd.f32 %v541_v55, %v2346_v7  ;;  %v544_v54 = vsel %vm536_vm10, %v532_v44, %v540_v52  ;;  %v543_v57 = vsel %vm535_vm11, %v531_v46, %v539_v42 }
 0x2df   :  { %v2401_v61 = vadd.f32 %v544_v54, %v2354_v12  ;;  %v2404_v62 = vadd.f32 %v543_v57, %v2364_v17  ;;  %v796_v44 = vsel %vm319_vm4, %v2442_v38, -inf }
 0x2e0   :  { %v552_v59 = vsel %vm319_vm4, %v2391_v41, -inf  ;;  %v549_v60 = vsel %vm319_vm4, %v2394_v45, -inf }
 0x2e1   :  { %553 = vmax.xlane.f32.xlu0 %v552_v59  ;;  %550 = vmax.xlane.f32.xlu1 %v549_v60  ;;  %v558_v5 = vsel %vm319_vm4, %v2401_v61, -inf  ;;  %v555_v6 = vsel %vm319_vm4, %v2404_v62, -inf }
 0x2e5   :  { %559 = vmax.xlane.f32.xlu0 %v558_v5  ;;  %556 = vmax.xlane.f32.xlu1 %v555_v6 }
 0x2e6   :  { %v975_v10 = vpop.trf.xlu1 }
 0x2e7   :  { %v1010_v13 = vrot.slane %v975_v10, %v2340_v0 }
 0x2e9   :  { %794 = vmax.xlane.f32.xlu0 %v793_v56  ;;  %791 = vmax.xlane.f32.xlu1 %v790_v14  ;;  %v1012_v20 = vadd.f32 %v1010_v13, %v2324_v43  ;;  %v1011_v21 = vadd.f32 %v1010_v13, %v2328_v48  ;;  %v1014_v23 = vadd.f32 %v1010_v13, %v2336_v58 }
 0x2ea   :  { %v1013_v25 = vadd.f32 %v1010_v13, %v2338_v63 }
 0x2eb   :  { %vm1016_vm15 = vcmp.gt.f32.partialorder %v1012_v20, 0.0  ;;  %v1020_v27 = vmul.f32 0.2, %v1012_v20  ;;  %vm1015_vm0 = vcmp.gt.f32.partialorder %v1011_v21, 0.0  ;;  %v1019_v29 = vmul.f32 0.2, %v1011_v21 }
 0x2ec   :  { %v1022_v35 = vmul.f32 0.2, %v1014_v23  ;;  %v1021_v36 = vmul.f32 0.2, %v1013_v25  ;;  %vm1018_vm2 = vcmp.gt.f32.partialorder %v1014_v23, 0.0  ;;  %vm1017_vm3 = vcmp.gt.f32.partialorder %v1013_v25, 0.0 }
 0x2ed   :  { %v1024_v33 = vsel %vm1016_vm15, %v1012_v20, %v1020_v27  ;;  %v1023_v34 = vsel %vm1015_vm0, %v1011_v21, %v1019_v29 }
 0x2ee   :  { %v2429_v43 = vadd.f32 %v1024_v33, %v2376_v26  ;;  %v2432_v48 = vadd.f32 %v1023_v34, %v2346_v7  ;;  %v1026_v39 = vsel %vm1018_vm2, %v1014_v23, %v1022_v35  ;;  %v1025_v40 = vsel %vm1017_vm3, %v1013_v25, %v1021_v36 }
 0x2ef   :  { %v799_v7 = vsel %vm319_vm4, %v2439_v37, -inf  ;;  %v2449_v46 = vadd.f32 %v1026_v39, %v2354_v12  ;;  %v2452_v47 = vadd.f32 %v1025_v40, %v2364_v17 }
 0x2f0   :  { %v1034_v58 = vsel %vm319_vm4, %v2429_v43, -inf  ;;  %v1031_v63 = vsel %vm319_vm4, %v2432_v48, -inf }
 0x2f1   :  { %1035 = vmax.xlane.f32.xlu0 %v1034_v58  ;;  %1032 = vmax.xlane.f32.xlu1 %v1031_v63  ;;  %v1040_v49 = vsel %vm319_vm4, %v2449_v46, -inf  ;;  %v1037_v50 = vsel %vm319_vm4, %v2452_v47, -inf }
 0x2f5   :  { %800 = vmax.xlane.f32.xlu0 %v799_v7  ;;  %797 = vmax.xlane.f32.xlu1 %v796_v44 }
 0x2f9   :  { %1041 = vmax.xlane.f32.xlu0 %v1040_v49  ;;  %1038 = vmax.xlane.f32.xlu1 %v1037_v50 }
 0x30a   :  { %2085 = vrot.lane.b32.xlu1 %v2300_v19, %s2205_s17 }
 0x30e   :  { %2090 = vrot.lane.b32.xlu1 %v2300_v19, %s2206_s18 }
 0x30f   :  { %2080 = vrot.lane.b32.xlu0 %v2306_v24, %s2197_s29 }
 0x316   :  { %v322_v12 = vpop.xlane.xlu0 %321 }
 0x317   :  { %v332_v52 = vsub.f32 %v2349_v11, %v322_v12 }
 0x319   :  { %v336_v53 = vmul.f32 1.442695, %v332_v52 }
 0x31a   :  { %v331_v17 = vpop.xlane.xlu0 %330 }
 0x31b   :  { %2106 = vpow2.f32 %v336_v53  ;;  %v335_v54 = vsub.f32 %v2359_v16, %v331_v17 }
 0x31d   :  { %v342_v19 = vmul.f32 1.442695, %v335_v54 }
 0x31e   :  { %v328_v42 = vpop.xlane.xlu0 %327 }
 0x31f   :  { %v334_v55 = vsub.f32 %v2369_v22, %v328_v42 }
 0x321   :  { %v340_v51 = vmul.f32 1.442695, %v334_v55 }
 0x323   :  { %2108 = vpow2.f32 %v340_v51 }
 0x325   :  { %v2468_v1 = vpop.eup %2106 }
 0x326   :  { %v325_v57 = vpop.xlane.xlu1 %324  ;;  %v344_v11 = vsel %vm319_vm4, %v2468_v1, 0.0 }
 0x327   :  { %v333_v59 = vsub.f32 %v2379_v28, %v325_v57 }
 0x329   :  { %v338_v60 = vmul.f32 1.442695, %v333_v59 }
 0x32b   :  { %2110 = vpow2.f32 %v338_v60 }
 0x32c   :  { %2112 = vpow2.f32 %v342_v19 }
 0x32d   :  { %v2472_v2 = vpop.eup %2108 }
 0x32e   :  { %v350_v16 = vsel %vm319_vm4, %v2472_v2, 0.0 }
 0x332   :  { %345 = vadd.xlane.f32.xlu1 %v344_v11 }
 0x335   :  { %v2474_v22 = vpop.eup %2110 }
 0x336   :  { %351 = vadd.xlane.f32.xlu1 %v350_v16  ;;  %v347_v28 = vsel %vm319_vm4, %v2474_v22, 0.0  ;;  %v2480_v3 = vpop.eup %2112 }
 0x337   :  { %348 = vadd.xlane.f32.xlu0 %v347_v28  ;;  %v353_v4 = vsel %vm319_vm4, %v2480_v3, 0.0 }
 0x33b   :  { %354 = vadd.xlane.f32.xlu0 %v353_v4 }
 0x36e   :  { %v554_v5 = vpop.xlane.xlu0 %553  ;;  %v551_v6 = vpop.xlane.xlu1 %550 }
 0x36f   :  { %v562_v10 = vsub.f32 %v2391_v41, %v554_v5  ;;  %v561_v13 = vsub.f32 %v2394_v45, %v551_v6 }
 0x371   :  { %v567_v56 = vmul.f32 1.442695, %v562_v10  ;;  %v565_v14 = vmul.f32 1.442695, %v561_v13 }
 0x372   :  { %v560_v15 = vpop.xlane.xlu0 %559  ;;  %v557_v18 = vpop.xlane.xlu1 %556 }
 0x373   :  { %2114 = vpow2.f32 %v567_v56  ;;  %v564_v20 = vsub.f32 %v2401_v61, %v560_v15  ;;  %v563_v21 = vsub.f32 %v2404_v62, %v557_v18 }
 0x374   :  { %2116 = vpow2.f32 %v565_v14 }
 0x375   :  { %v571_v23 = vmul.f32 1.442695, %v564_v20  ;;  %v569_v25 = vmul.f32 1.442695, %v563_v21 }
 0x376   :  { %v795_v27 = vpop.xlane.xlu0 %794  ;;  %v792_v29 = vpop.xlane.xlu1 %791 }
 0x377   :  { %2118 = vpow2.f32 %v571_v23  ;;  %v803_v31 = vsub.f32 %v2413_v8, %v795_v27  ;;  %v802_v41 = vsub.f32 %v2416_v9, %v792_v29 }
 0x378   :  { %2120 = vpow2.f32 %v569_v25 }
 0x379   :  { %v808_v45 = vmul.f32 1.442695, %v803_v31  ;;  %v806_v32 = vmul.f32 1.442695, %v802_v41 }
 0x37b   :  { %2122 = vpow2.f32 %v808_v45 }
 0x37c   :  { %2124 = vpow2.f32 %v806_v32 }
 0x37d   :  { %v2490_v33 = vpop.eup %2114 }
 0x37e   :  { %v2492_v61 = vpop.eup %2116  ;;  %v1036_v62 = vpop.xlane.xlu0 %1035  ;;  %v576_v35 = vsel %vm319_vm4, %v2490_v33, 0.0 }
 0x37f   :  { %v1033_v34 = vpop.xlane.xlu1 %1032  ;;  %v1044_v36 = vsub.f32 %v2429_v43, %v1036_v62  ;;  %577 = vadd.xlane.f32.xlu0 %v576_v35  ;;  %v573_v9 = vsel %vm319_vm4, %v2492_v61, 0.0 }
 0x380   :  { %v1043_v8 = vsub.f32 %v2432_v48, %v1033_v34  ;;  %574 = vadd.xlane.f32.xlu1 %v573_v9 }
 0x381   :  { %v2500_v58 = vpop.eup %2118  ;;  %v1049_v63 = vmul.f32 1.442695, %v1044_v36 }
 0x382   :  { %v1047_v39 = vmul.f32 1.442695, %v1043_v8  ;;  %v2502_v40 = vpop.eup %2120  ;;  %v801_v7 = vpop.xlane.xlu0 %800  ;;  %v582_v49 = vsel %vm319_vm4, %v2500_v58, 0.0 }
 0x383   :  { %v798_v44 = vpop.xlane.xlu1 %797  ;;  %2126 = vpow2.f32 %v1049_v63  ;;  %v805_v43 = vsub.f32 %v2439_v37, %v801_v7  ;;  %583 = vadd.xlane.f32.xlu0 %v582_v49  ;;  %v579_v50 = vsel %vm319_vm4, %v2502_v40, 0.0 }
 0x384   :  { %v804_v48 = vsub.f32 %v2442_v38, %v798_v44  ;;  %2128 = vpow2.f32 %v1047_v39  ;;  %580 = vadd.xlane.f32.xlu1 %v579_v50 }
 0x385   :  { %v2510_v12 = vpop.eup %2122  ;;  %v812_v17 = vmul.f32 1.442695, %v805_v43 }
 0x386   :  { %v810_v52 = vmul.f32 1.442695, %v804_v48  ;;  %v2512_v42 = vpop.eup %2124  ;;  %v1042_v53 = vpop.xlane.xlu0 %1041  ;;  %v817_v51 = vsel %vm319_vm4, %v2510_v12, 0.0 }
 0x387   :  { %v1039_v55 = vpop.xlane.xlu1 %1038  ;;  %2130 = vpow2.f32 %v812_v17  ;;  %v1046_v37 = vsub.f32 %v2449_v46, %v1042_v53  ;;  %818 = vadd.xlane.f32.xlu0 %v817_v51  ;;  %v814_v54 = vsel %vm319_vm4, %v2512_v42, 0.0 }
 0x388   :  { %v1045_v38 = vsub.f32 %v2452_v47, %v1039_v55  ;;  %2132 = vpow2.f32 %v810_v52  ;;  %815 = vadd.xlane.f32.xlu1 %v814_v54 }
 0x389   :  { %v1053_v57 = vmul.f32 1.442695, %v1046_v37 }
 0x38a   :  { %v1051_v59 = vmul.f32 1.442695, %v1045_v38  ;;  %v2081_v23 = vpop.permute.xlu0 %2080 }
 0x38b   :  { %v2086_v19 = vpop.permute.xlu1 %2085  ;;  %2134 = vpow2.f32 %v1053_v57  ;;  %v2083_v35 = vunpack.i.h.bf16 %v2081_v23  ;;  %v2082_v36 = vunpack.i.l.bf16 %v2081_v23 }
 0x38c   :  { %v2088_v60 = vunpack.i.h.bf16 %v2086_v19  ;;  %2136 = vpow2.f32 %v1051_v59  ;;  %v2087_v11 = vunpack.i.l.bf16 %v2086_v19 }
 0x38d   :  { %v2520_v16 = vpop.eup %2126  ;;  %v1999_v39 = vpack.c.bf16 %v2083_v35, %v2082_v36 }
 0x38e   :  { %v2522_v28 = vpop.eup %2128  ;;  %v2003_v46 = vpack.c.bf16 %v2088_v60, %v2087_v11  ;;  %v1058_v47 = vsel %vm319_vm4, %v2520_v16, 0.0 }
 0x38f   :  { %1059 = vadd.xlane.f32.xlu0 %v1058_v47  ;;  %v1055_v4 = vsel %vm319_vm4, %v2522_v28, 0.0  ;;  %v2091_v20 = vpop.permute.xlu1 %2090 }
 0x390   :  { %1056 = vadd.xlane.f32.xlu1 %v1055_v4  ;;  %2004 = vmatprep.subr.bf16.mxu1 %v2003_v46  ;;  %v2093_v7 = vunpack.i.h.bf16 %v2091_v20  ;;  %v2092_v44 = vunpack.i.l.bf16 %v2091_v20 }
 0x391   :  { %v2528_v5 = vpop.eup %2130  ;;  %2006 = vmatpush3.bf16.msra.mxu1 %v2003_v46 }
 0x392   :  { %v2530_v6 = vpop.eup %2132  ;;  %v823_v10 = vsel %vm319_vm4, %v2528_v5, 0.0  ;;  %v2011_v43 = vpack.c.bf16 %v2093_v7, %v2092_v44 }
 0x393   :  { %824 = vadd.xlane.f32.xlu0 %v823_v10  ;;  %v820_v13 = vsel %vm319_vm4, %v2530_v6, 0.0 }
 0x394   :  { %821 = vadd.xlane.f32.xlu1 %v820_v13 }
 0x395   :  { %v2536_v56 = vpop.eup %2134 }
 0x396   :  { %v2538_v14 = vpop.eup %2136  ;;  %v1064_v15 = vsel %vm319_vm4, %v2536_v56, 0.0 }
 0x397   :  { %1065 = vadd.xlane.f32.xlu0 %v1064_v15  ;;  %v1061_v18 = vsel %vm319_vm4, %v2538_v14, 0.0 }
 0x398   :  { %1062 = vadd.xlane.f32.xlu1 %v1061_v18 }
 0x3a9   :  { %2100 = vrot.lane.b32.xlu1 %v2306_v24, %s2206_s18 }
 0x3ad   :  { %2095 = vrot.lane.b32.xlu0 %v2306_v24, %s2205_s17 }
 0x3bf   :  { %v346_v21 = vpop.xlane.xlu1 %345 }
 0x3c0   :  { %v356_v25 = vmax.f32 %v346_v21, 1e-20 }
 0x3c2   :  { %2138 = vrcp.f32 %v356_v25 }
 0x3c3   :  { %v352_v27 = vpop.xlane.xlu1 %351 }
 0x3c4   :  { %v358_v29 = vmax.f32 %v352_v27, 1e-20  ;;  %v349_v31 = vpop.xlane.xlu0 %348 }
 0x3c5   :  { %v357_v41 = vmax.f32 %v349_v31, 1e-20 }
 0x3c6   :  { %2140 = vrcp.f32 %v358_v29 }
 0x3c7   :  { %2142 = vrcp.f32 %v357_v41 }
 0x3c8   :  { %v355_v45 = vpop.xlane.xlu0 %354 }
 0x3c9   :  { %v359_v32 = vmax.f32 %v355_v45, 1e-20 }
 0x3cb   :  { %2144 = vrcp.f32 %v359_v32 }
 0x3cc   :  { %v2139_v62 = vpop.eup %2138 }
 0x3cd   :  { %v364_v34 = vmul.f32 %v2139_v62, %v2468_v1 }
 0x3cf   :  { %1879 = vmatprep.mubr.msk.f32.mxu0 %vm319_vm4, %v364_v34 }
 0x3d0   :  { %v2141_v24 = vpop.eup %2140 }
 0x3d1   :  { %v2143_v8 = vpop.eup %2142  ;;  %v366_v63 = vmul.f32 %v2141_v24, %v2472_v2 }
 0x3d2   :  { %v365_v9 = vmul.f32 %v2143_v8, %v2474_v22 }
 0x3d4   :  { %1880 = vmatmul.mubr.msk.f32.vlgmr.msra.gmra.mrb[4].mxu0 %vm319_vm4, %v365_v9 }
 0x3d5   :  { %v2145_v49 = vpop.eup %2144  ;;  %1998 = vmatpush3.bf16.msra.mxu0 %v2309_v30  ;;  %1882 = vmatprep.mubr.msk.f32.mxu0 %vm319_vm4, %v366_v63 }
 0x3d6   :  { %2000 = vmatprep.subr.bf16.mxu0 %v1999_v39  ;;  %v367_v1 = vmul.f32 %v2145_v49, %v2480_v3 }
 0x3d8   :  { %1883 = vmatmul.mubr.msk.f32.gmra.mrb[6].mxu0 %vm319_vm4, %v367_v1 }
 0x3d9   :  { %2002 = vmatpush3.bf16.msra.mxu0 %v1999_v39 }
 0x3da   :  { %2012 = vmatprep.subr.bf16.mxu0 %v2011_v43 }
 0x40c   :  { %v578_v22 = vpop.xlane.xlu0 %577 }
 0x40d   :  { %v586_v2 = vmax.f32 %v578_v22, 1e-20  ;;  %v575_v48 = vpop.xlane.xlu1 %574 }
 0x40e   :  { %v585_v50 = vmax.f32 %v575_v48, 1e-20 }
 0x40f   :  { %2146 = vrcp.f32 %v586_v2 }
 0x410   :  { %2148 = vrcp.f32 %v585_v50  ;;  %v584_v17 = vpop.xlane.xlu0 %583 }
 0x411   :  { %v588_v52 = vmax.f32 %v584_v17, 1e-20  ;;  %v581_v53 = vpop.xlane.xlu1 %580 }
 0x412   :  { %v587_v30 = vmax.f32 %v581_v53, 1e-20 }
 0x413   :  { %2150 = vrcp.f32 %v588_v52 }
 0x414   :  { %2152 = vrcp.f32 %v587_v30  ;;  %v819_v3 = vpop.xlane.xlu0 %818 }
 0x415   :  { %v816_v55 = vpop.xlane.xlu1 %815  ;;  %v827_v46 = vmax.f32 %v819_v3, 1e-20  ;;  %v1281_v3 = vld [vmem:[%s2689_s5 + $0x8] sm:$0xff] }
 0x416   :  { %v826_v51 = vmax.f32 %v816_v55, 1e-20 }
 0x418   :  { %2154 = vrcp.f32 %v826_v51  ;;  %v1280_v51 = vld [vmem:[%s2689_s5] sm:$0xff] }
 0x419   :  { %v2147_v37 = vpop.eup %2146 }
 0x41a   :  { %v2149_v38 = vpop.eup %2148  ;;  %v594_v54 = vmul.f32 %v2147_v37, %v2490_v33 }
 0x41b   :  { %v593_v57 = vmul.f32 %v2149_v38, %v2492_v61  ;;  %v2019_v38 = vpack.c.bf16 %v1281_v3, %v1280_v51 }
 0x41c   :  { %v1060_v59 = vpop.xlane.xlu0 %1059 }
 0x41d   :  { %v2151_v19 = vpop.eup %2150  ;;  %1893 = vmatprep.mubr.msk.f32.mxu0 %vm319_vm4, %v593_v57  ;;  %v1057_v60 = vpop.xlane.xlu1 %1056  ;;  %v1068_v10 = vmax.f32 %v1060_v59, 1e-20  ;;  %v1283_v57 = vld [vmem:[%s2689_s5 + $0x18] sm:$0xff] }
 0x41e   :  { %v2153_v11 = vpop.eup %2152  ;;  %v1067_v47 = vmax.f32 %v1057_v60, 1e-20  ;;  %1894 = vmatmul.mubr.msk.f32.vlgmr.msra.gmra.mrb[8].mxu0 %vm319_vm4, %v594_v54  ;;  %v596_v4 = vmul.f32 %v2151_v19, %v2500_v58  ;;  %v1282_v54 = vld [vmem:[%s2689_s5 + $0x10] sm:$0xff]  ;;  %v1284_v19 = vld [vmem:[%s2689_s5 + $0x20] sm:$0xff]  ;;  %v1285_v60 = vld [vmem:[%s2689_s5 + $0x28] sm:$0xff] }
 0x41f   :  { %2014 = vmatpush3.bf16.msra.mxu0 %v2011_v43  ;;  %v595_v13 = vmul.f32 %v2153_v11, %v2502_v40  ;;  %v2023_v59 = vpack.c.bf16 %v1283_v57, %v1282_v54  ;;  %v2027_v11 = vpack.c.bf16 %v1285_v60, %v1284_v19 }
 0x420   :  { %2156 = vrcp.f32 %v1067_v47  ;;  %v825_v33 = vpop.xlane.xlu0 %824  ;;  %v1287_v47 = vld [vmem:[%s2689_s5 + $0x38] sm:$0xff] }
 0x421   :  { %1896 = vmatprep.mubr.msk.f32.mxu0 %vm319_vm4, %v595_v13  ;;  %v822_v61 = vpop.xlane.xlu1 %821  ;;  %2158 = vrcp.f32 %v827_v46  ;;  %v829_v18 = vmax.f32 %v825_v33, 1e-20  ;;  %v1286_v46 = vld [vmem:[%s2689_s5 + $0x30] sm:$0xff] }
 0x422   :  { %v2155_v15 = vpop.eup %2154  ;;  %v828_v20 = vmax.f32 %v822_v61, 1e-20  ;;  %1897 = vmatmul.mubr.msk.f32.gmra.mrb[10].mxu0 %vm319_vm4, %v596_v4  ;;  %2160 = vrcp.f32 %v1068_v10  ;;  %v2031_v4 = vpack.c.bf16 %v1287_v47, %v1286_v46  ;;  %v1288_v10 = vld [vmem:[%s2690_s6] sm:$0xf] }
 0x423   :  { %v834_v21 = vmul.f32 %v2155_v15, %v2512_v42 }
 0x424   :  { %2162 = vrcp.f32 %v828_v20  ;;  %v1066_v58 = vpop.xlane.xlu0 %1065 }
 0x425   :  { %v1070_v23 = vmax.f32 %v1066_v58, 1e-20  ;;  %1907 = vmatprep.mubr.msk.f32.mxu1 %vm319_vm4, %v834_v21  ;;  %v1063_v40 = vpop.xlane.xlu1 %1062  ;;  %2164 = vrcp.f32 %v829_v18 }
 0x426   :  { %v1069_v25 = vmax.f32 %v1063_v40, 1e-20  ;;  %v1748_v40 = vld [vmem:[%s2691_s4] ss:$0 sm:$0xff] }
 0x427   :  { %2166 = vrcp.f32 %v1070_v23 }
 0x428   :  { %2168 = vrcp.f32 %v1069_v25  ;;  %v2096_v27 = vpop.permute.xlu0 %2095 }
 0x429   :  { %v2098_v29 = vunpack.i.h.bf16 %v2096_v27  ;;  %v2097_v31 = vunpack.i.l.bf16 %v2096_v27  ;;  %v2101_v41 = vpop.permute.xlu1 %2100 }
 0x42a   :  { %v2157_v45 = vpop.eup %2156  ;;  %v2103_v32 = vunpack.i.h.bf16 %v2101_v41  ;;  %v2102_v62 = vunpack.i.l.bf16 %v2101_v41 }
 0x42b   :  { %v2007_v34 = vpack.c.bf16 %v2098_v29, %v2097_v31  ;;  %v1075_v42 = vmul.f32 %v2157_v45, %v2522_v28  ;;  %v2159_v24 = vpop.eup %2158 }
 0x42c   :  { %v2015_v35 = vpack.c.bf16 %v2103_v32, %v2102_v62  ;;  %v2161_v36 = vpop.eup %2160  ;;  %v835_v9 = vmul.f32 %v2159_v24, %v2510_v12 }
 0x42d   :  { %1921 = vmatprep.mubr.msk.f32.mxu0 %vm319_vm4, %v1075_v42  ;;  %2008 = vmatprep.subr.bf16.mxu1 %v2007_v34  ;;  %v1076_v39 = vmul.f32 %v2161_v36, %v2520_v16 }
 0x42e   :  { %v2163_v8 = vpop.eup %2162  ;;  %2016 = vmatprep.subr.bf16.mxu0 %v2015_v35  ;;  %2010 = vmatpush3.bf16.msra.mxu1 %v2007_v34 }
 0x42f   :  { %2018 = vmatpush3.bf16.msra.mxu0 %v2015_v35  ;;  %v2165_v63 = vpop.eup %2164  ;;  %v836_v7 = vmul.f32 %v2163_v8, %v2530_v6  ;;  %2020 = vmatprep.subr.bf16.mxu1 %v2019_v38 }
 0x430   :  { %v837_v12 = vmul.f32 %v2165_v63, %v2528_v5  ;;  %1949 = vmatprep.subr.msk.mxu0 %vm1400_vm5, %v1288_v10 }
 0x431   :  { %v2167_v44 = vpop.eup %2166  ;;  %1908 = vmatmul.mubr.msk.f32.vlgmr.msra.gmra.mrb[4].mxu1 %vm319_vm4, %v835_v9 }
 0x432   :  { %v2169_v28 = vpop.eup %2168  ;;  %1922 = vmatmul.mubr.msk.f32.vlgmr.msra.gmra.mrb[12].mxu0 %vm319_vm4, %v1076_v39  ;;  %1910 = vmatprep.mubr.msk.f32.mxu1 %vm319_vm4, %v836_v7  ;;  %v1078_v49 = vmul.f32 %v2167_v44, %v2536_v56 }
 0x433   :  { %v1077_v1 = vmul.f32 %v2169_v28, %v2538_v14  ;;  %2022 = vmatpush3.bf16.msra.mxu1 %v2019_v38  ;;  %1950 = vmatpush3.msk.msra.mxu0 %vm1400_vm5, %v1288_v10 }
 0x434   :  { %2024 = vmatprep.subr.bf16.mxu1 %v2023_v59 }
 0x435   :  { %1924 = vmatprep.mubr.msk.f32.mxu0 %vm319_vm4, %v1077_v1  ;;  %1911 = vmatmul.mubr.msk.f32.gmra.mrb[6].mxu1 %vm319_vm4, %v837_v12 }
 0x436   :  { %1925 = vmatmul.mubr.msk.f32.gmra.mrb[14].mxu0 %vm319_vm4, %v1078_v49 }
 0x437   :  { %2026 = vmatpush3.bf16.msra.mxu1 %v2023_v59 }
 0x438   :  { %2028 = vmatprep.subr.bf16.mxu1 %v2027_v11 }
 0x43b   :  { %2030 = vmatpush3.bf16.msra.mxu1 %v2027_v11 }
 0x43c   :  { %2032 = vmatprep.subr.bf16.mxu1 %v2031_v4 }
 0x43f   :  { %2034 = vmatpush3.bf16.msra.mxu1 %v2031_v4 }
 0x4a7   :  { %v2581_v16 = vpop.f32.mrb[4].mxu0 }
 0x4a8   :  { %v2583_v6 = vpop.f32.mrb[5].mxu0 }
 0x4ab   :  { %v2585_v43 = vpop.f32.mrb[6].mxu0 }
 0x4ac   :  { %v2587_v22 = vpop.f32.mrb[7].mxu0 }
 0x4f1   :  { %v1895_v2 = vpop.f32.mrb[8].mxu0 }
 0x4f2   :  { %1194 = vrot.lane.b32.xlu1 %v1895_v2, %s2207_s19  ;;  %v687_v56 = vpop.f32.mrb[9].mxu0 }
 0x4f3   :  { %1192 = vrot.lane.b32.xlu0 %v687_v56, %s2207_s19 }
 0x4f5   :  { %v1898_v5 = vpop.f32.mrb[10].mxu0 }
 0x4f6   :  { %v697_v14 = vpop.f32.mrb[11].mxu0 }
 0x504   :  { %v1909_v48 = vpop.f32.mrb[4].mxu1 }
 0x505   :  { %v1923_v50 = vpop.f32.mrb[12].mxu0  ;;  %1210 = vrot.lane.b32.xlu1 %v1909_v48, %s2208_s20  ;;  %v928_v17 = vpop.f32.mrb[5].mxu1 }
 0x506   :  { %v1169_v52 = vpop.f32.mrb[13].mxu0  ;;  %1208 = vrot.lane.b32.xlu0 %v928_v17, %s2208_s20 }
 0x508   :  { %v1912_v53 = vpop.f32.mrb[6].mxu1 }
 0x509   :  { %v1926_v30 = vpop.f32.mrb[14].mxu0  ;;  %1198 = vrot.lane.b32.xlu1 %v1898_v5, %s2207_s19  ;;  %v938_v55 = vpop.f32.mrb[7].mxu1 }
 0x50a   :  { %v1179_v37 = vpop.f32.mrb[15].mxu0  ;;  %1196 = vrot.lane.b32.xlu0 %v697_v14, %s2207_s19 }
 0x50d   :  { %1214 = vrot.lane.b32.xlu1 %v1912_v53, %s2208_s20  ;;  %v2210_v53 = vmov 1  }
 0x50e   :  { %1212 = vrot.lane.b32.xlu0 %v938_v55, %s2208_s20  ;;  %2105 = vset.pattern.permute.xlu1 %v2210_v53 }
 0x50f   :  { %2104 = vset.pattern.permute.xlu0 %v2210_v53 }
 0x511   :  { %1226 = vrot.lane.b32.xlu1 %v1923_v50, %s2209_s0 }
 0x512   :  { %1224 = vrot.lane.b32.xlu0 %v1169_v52, %s2209_s0 }
 0x515   :  { %1230 = vrot.lane.b32.xlu1 %v1926_v30, %s2209_s0 }
 0x516   :  { %1228 = vrot.lane.b32.xlu0 %v1179_v37, %s2209_s0 }
 0x564   :  { %v1195_v13 = vpop.permute.xlu1 %1194 }
 0x565   :  { %v1193_v33 = vpop.permute.xlu0 %1192  ;;  %v1238_v23 = vsel %vm1236_vm6, %v2581_v16, %v1195_v13 }
 0x566   :  { %v1237_v25 = vsel %vm1236_vm6, %v2583_v6, %v1193_v33 }
 0x577   :  { %v1211_v61 = vpop.permute.xlu1 %1210 }
 0x578   :  { %v1209_v15 = vpop.permute.xlu0 %1208  ;;  %v1242_v27 = vsel %vm319_vm4, %v1238_v23, %v1211_v61 }
 0x579   :  { %v1241_v31 = vsel %vm319_vm4, %v1237_v25, %v1209_v15 }
 0x57b   :  { %v1199_v18 = vpop.permute.xlu1 %1198 }
 0x57c   :  { %v1197_v20 = vpop.permute.xlu0 %1196  ;;  %v1240_v34 = vsel %vm1236_vm6, %v2585_v43, %v1199_v18 }
 0x57d   :  { %v1239_v24 = vsel %vm1236_vm6, %v2587_v22, %v1197_v20 }
 0x57f   :  { %v1215_v21 = vpop.permute.xlu1 %1214 }
 0x580   :  { %v1213_v58 = vpop.permute.xlu0 %1212  ;;  %v1244_v35 = vsel %vm319_vm4, %v1240_v34, %v1215_v21  ;;  %v2196_v34 = vld [vmem:[%s2688_s1 + $0x18] sm:$0xff] }
 0x581   :  { %v1243_v9 = vsel %vm319_vm4, %v1239_v24, %v1213_v58 }
 0x583   :  { %v1227_v29 = vpop.permute.xlu1 %1226 }
 0x584   :  { %v1247_v41 = vsel %vm1245_vm7, %v1242_v27, %v1227_v29  ;;  %v1225_v45 = vpop.permute.xlu0 %1224 }
 0x585   :  { %v1257_v32 = vadd.f32 %v1748_v40, %v1247_v41  ;;  %v1246_v62 = vsel %vm1245_vm7, %v1241_v31, %v1225_v45  ;;  %v2195_v45 = vld [vmem:[%s2688_s1 + $0x10] sm:$0xff] }
 0x586   :  { %v1256_v42 = vadd.f32 %v1748_v40, %v1246_v62 }
 0x587   :  { %v1266_v36 = vmul.f32 1.442695, %v1257_v32  ;;  %v1231_v8 = vpop.permute.xlu1 %1230  ;;  %vm1261_vm9 = vcmp.gt.f32.partialorder %v1257_v32, 0.0 }
 0x588   :  { %v1264_v63 = vmul.f32 1.442695, %v1256_v42  ;;  %v1249_v39 = vsel %vm1245_vm7, %v1244_v35, %v1231_v8  ;;  %v1229_v7 = vpop.permute.xlu0 %1228  ;;  %vm1260_vm8 = vcmp.gt.f32.partialorder %v1256_v42, 0.0 }
 0x589   :  { %2170 = vpow2.f32 %v1266_v36  ;;  %v1259_v44 = vadd.f32 %v1748_v40, %v1249_v39  ;;  %v1248_v28 = vsel %vm1245_vm7, %v1243_v9, %v1229_v7 }
 0x58a   :  { %2172 = vpow2.f32 %v1264_v63  ;;  %v1258_v49 = vadd.f32 %v1748_v40, %v1248_v28 }
 0x58b   :  { %v1270_v1 = vmul.f32 1.442695, %v1259_v44  ;;  %vm1263_vm11 = vcmp.gt.f32.partialorder %v1259_v44, 0.0 }
 0x58c   :  { %v1268_v12 = vmul.f32 1.442695, %v1258_v49  ;;  %vm1262_vm10 = vcmp.gt.f32.partialorder %v1258_v49, 0.0 }
 0x58d   :  { %2174 = vpow2.f32 %v1270_v1 }
 0x58e   :  { %2176 = vpow2.f32 %v1268_v12 }
 0x593   :  { %v2171_v16 = vpop.eup %2170 }
 0x594   :  { %v2173_v6 = vpop.eup %2172  ;;  %v1750_v43 = vadd.f32 -1.0, %v2171_v16 }
 0x595   :  { %v1749_v22 = vadd.f32 -1.0, %v2173_v6 }
 0x596   :  { %v1277_v14 = vsel %vm1261_vm9, %v1257_v32, %v1750_v43 }
 0x597   :  { %v2175_v2 = vpop.eup %2174  ;;  %v1276_v56 = vsel %vm1260_vm8, %v1256_v42, %v1749_v22 }
 0x598   :  { %v2177_v5 = vpop.eup %2176  ;;  %1943 = vmatprep.mubr.msk.f32.mxu1 %vm145_vm1, %v1276_v56  ;;  %v1752_v48 = vadd.f32 -1.0, %v2175_v2 }
 0x599   :  { %1944 = vmatmul.mubr.msk.f32.vlgmr.msra.gmra.mrb[8].mxu1 %vm145_vm1, %v1277_v14  ;;  %v1751_v50 = vadd.f32 -1.0, %v2177_v5 }
 0x59a   :  { %v1279_v52 = vsel %vm1263_vm11, %v1259_v44, %v1752_v48 }
 0x59b   :  { %v1278_v17 = vsel %vm1262_vm10, %v1258_v49, %v1751_v50 }
 0x59c   :  { %1946 = vmatprep.mubr.msk.f32.mxu1 %vm145_vm1, %v1278_v17 }
 0x59d   :  { %1947 = vmatmul.mubr.msk.f32.gmra.mrb[10].mxu1 %vm145_vm1, %v1279_v52 }
 0x66c   :  { %v1945_v30 = vpop.f32.mrb[8].mxu1 }
 0x66d   :  { %v1368_v55 = vpop.f32.mrb[9].mxu1 }
 0x66e   :  { %v2035_v51 = vpack.c.bf16 %v1945_v30, %v1368_v55  ;;  %1951 = vmatprep.mubr.msk.f32.mxu0 %vm1387_vm12, %v1368_v55 }
 0x66f   :  { %1952 = vmatmul.mubr.msk.f32.vlgmr.msra.gmra.mrb[16].mxu0 %vm1387_vm12, %v1945_v30 }
 0x670   :  { %v1948_v3 = vpop.f32.mrb[10].mxu1  ;;  %2036 = vmatprep.subr.bf16.mxu0 %v2035_v51 }
 0x671   :  { %v1378_v37 = vpop.f32.mrb[11].mxu1  ;;  %2038 = vmatpush3.bf16.msra.mxu0 %v2035_v51 }
 0x672   :  { %v2039_v38 = vpack.c.bf16 %v1948_v3, %v1378_v37  ;;  %1954 = vmatprep.mubr.msk.f32.mxu0 %vm1387_vm12, %v1378_v37 }
 0x673   :  { %1955 = vmatmul.mubr.msk.f32.gmra.mrb[18].mxu0 %vm1387_vm12, %v1948_v3 }
 0x674   :  { %2040 = vmatprep.subr.bf16.mxu0 %v2039_v38 }
 0x675   :  { %2042 = vmatpush3.bf16.msra.mxu0 %v2039_v38 }
 0x742   :  { %v1953_v54 = vpop.f32.mrb[16].mxu0 }
 0x743   :  { %1528 = vperm.xlu1 %2105, %v1953_v54   ;;  %v1470_v57 = vpop.f32.mrb[17].mxu0 }
 0x744   :  { %1523 = vperm.xlu0 %2104, %v1470_v57  }
 0x746   :  { %v1956_v59 = vpop.f32.mrb[18].mxu0 }
 0x747   :  { %v1480_v19 = vpop.f32.mrb[19].mxu0 }
 0x748   :  { %1538 = vperm.xlu0 %2104, %v1956_v59   ;;  %1533 = vperm.xlu1 %2105, %v1480_v19  }
 0x771   :  { %1489 = vxpose.xlu1.b32.start [1/4] (short) (narrow) %v1470_v57, 8 }
 0x775   :  { %1490 = vxpose.xlu1.b32.cont [2/4] (short) (narrow) %v1953_v54, 8 }
 0x779   :  { %1491 = vxpose.xlu1.b32.cont [3/4] (short) (narrow) %v1480_v19, 8 }
 0x77d   :  { %1492 = vxpose.xlu1.b32.end [4/4] (short) (narrow) %v1956_v59, 8 }
 0x7c2   :  { %v1529_v60 = vpop.permute.xlu1 %1528 }
 0x7c3   :  { %v1524_v46 = vpop.permute.xlu0 %1523 }
 0x7c7   :  { %v1534_v11 = vpop.permute.xlu1 %1533  ;;  %v1539_v18 = vpop.permute.xlu0 %1538 }
 0x7f1   :  { %v1505_v47 = vpop.trf.xlu1 }
 0x7f2   :  { %v1544_v4 = vrot.slane %v1505_v47, %v2340_v0  ;;  %v2194_v0 = vld [vmem:[%s2688_s1] sm:$0xff] }
 0x7f4   :  { %v1546_v10 = vadd.f32 %v1544_v4, %v1529_v60  ;;  %v1545_v13 = vadd.f32 %v1544_v4, %v1524_v46  ;;  %v1547_v33 = vadd.f32 %v1544_v4, %v1534_v11  ;;  %v1548_v23 = vadd.f32 %v1544_v4, %v1539_v18  ;;  %v1762_v11 = vld [vmem:[%s2692_s7] ss:$0 sm:$0xff] }
 0x7f6   :  { %vm1550_vm1 = vcmp.gt.f32.partialorder %v1546_v10, 0.0  ;;  %v1554_v61 = vmul.f32 0.2, %v1546_v10  ;;  %vm1549_vm13 = vcmp.gt.f32.partialorder %v1545_v13, 0.0  ;;  %v1553_v15 = vmul.f32 0.2, %v1545_v13 }
 0x7f7   :  { %v1555_v58 = vmul.f32 0.2, %v1547_v33  ;;  %vm1551_vm14 = vcmp.gt.f32.partialorder %v1547_v33, 0.0  ;;  %v1556_v31 = vmul.f32 0.2, %v1548_v23  ;;  %vm1552_vm15 = vcmp.gt.f32.partialorder %v1548_v23, 0.0 }
 0x7f8   :  { %v1558_v20 = vsel %vm1550_vm1, %v1546_v10, %v1554_v61  ;;  %v1557_v21 = vsel %vm1549_vm13, %v1545_v13, %v1553_v15 }
 0x7f9   :  { %v1562_v40 = vadd.f32 %v1558_v20, %v2376_v26  ;;  %v1561_v27 = vadd.f32 %v2194_v0, %v1557_v21  ;;  %v1559_v29 = vsel %vm1551_vm14, %v1547_v33, %v1555_v58  ;;  %v1560_v26 = vsel %vm1552_vm15, %v1548_v23, %v1556_v31 }
 0x7fa   :  { %v1563_v32 = vadd.f32 %v2195_v45, %v1559_v29  ;;  %v1564_v42 = vadd.f32 %v2196_v34, %v1560_v26 }
 0x7fb   :  { %v1568_v25 = vsel %vm319_vm4, %v1562_v40, -inf  ;;  %v1565_v41 = vsel %vm319_vm4, %v1561_v27, -inf }
 0x7fc   :  { %1569 = vmax.xlane.f32.xlu0 %v1568_v25  ;;  %v1571_v62 = vsel %vm319_vm4, %v1563_v32, -inf  ;;  %v1574_v24 = vsel %vm319_vm4, %v1564_v42, -inf }
 0x800   :  { %1566 = vmax.xlane.f32.xlu0 %v1565_v41 }
 0x804   :  { %1572 = vmax.xlane.f32.xlu0 %v1571_v62 }
 0x808   :  { %1575 = vmax.xlane.f32.xlu0 %v1574_v24 }
 0x889   :  { %v1570_v35 = vpop.xlane.xlu0 %1569 }
 0x88a   :  { %v1578_v36 = vsub.f32 %v1562_v40, %v1570_v35 }
 0x88c   :  { %v1583_v63 = vmul.f32 1.442695, %v1578_v36 }
 0x88d   :  { %v1567_v8 = vpop.xlane.xlu0 %1566 }
 0x88e   :  { %v1577_v9 = vsub.f32 %v1561_v27, %v1567_v8 }
 0x890   :  { %v1581_v39 = vmul.f32 1.442695, %v1577_v9 }
 0x891   :  { %v1573_v7 = vpop.xlane.xlu0 %1572 }
 0x892   :  { %2178 = vpow2.f32 %v1581_v39  ;;  %v1579_v44 = vsub.f32 %v1563_v32, %v1573_v7 }
 0x893   :  { %2180 = vpow2.f32 %v1583_v63 }
 0x894   :  { %v1585_v28 = vmul.f32 1.442695, %v1579_v44 }
 0x895   :  { %v1576_v49 = vpop.xlane.xlu0 %1575 }
 0x896   :  { %2182 = vpow2.f32 %v1585_v28  ;;  %v1580_v1 = vsub.f32 %v1564_v42, %v1576_v49 }
 0x898   :  { %v1587_v12 = vmul.f32 1.442695, %v1580_v1 }
 0x89a   :  { %2184 = vpow2.f32 %v1587_v12 }
 0x89c   :  { %v2179_v16 = vpop.eup %2178 }
 0x89d   :  { %v1589_v6 = vsel %vm319_vm4, %v2179_v16, 0.0  ;;  %v2181_v43 = vpop.eup %2180 }
 0x89e   :  { %1590 = vadd.xlane.f32.xlu0 %v1589_v6  ;;  %v1592_v2 = vsel %vm319_vm4, %v2181_v43, 0.0 }
 0x8a0   :  { %v2183_v22 = vpop.eup %2182 }
 0x8a1   :  { %v1595_v56 = vsel %vm319_vm4, %v2183_v22, 0.0 }
 0x8a2   :  { %1593 = vadd.xlane.f32.xlu0 %v1592_v2  ;;  %1596 = vadd.xlane.f32.xlu1 %v1595_v56 }
 0x8a4   :  { %v2185_v5 = vpop.eup %2184 }
 0x8a5   :  { %v1598_v14 = vsel %vm319_vm4, %v2185_v5, 0.0 }
 0x8a6   :  { %1599 = vadd.xlane.f32.xlu0 %v1598_v14 }
 0x92b   :  { %v1591_v48 = vpop.xlane.xlu0 %1590 }
 0x92c   :  { %v1601_v50 = vmax.f32 %v1591_v48, 1e-20 }
 0x92e   :  { %2186 = vrcp.f32 %v1601_v50 }
 0x92f   :  { %v1597_v17 = vpop.xlane.xlu1 %1596  ;;  %v1594_v52 = vpop.xlane.xlu0 %1593 }
 0x930   :  { %v1603_v53 = vmax.f32 %v1597_v17, 1e-20  ;;  %v1602_v30 = vmax.f32 %v1594_v52, 1e-20 }
 0x932   :  { %2188 = vrcp.f32 %v1603_v53 }
 0x933   :  { %2190 = vrcp.f32 %v1602_v30  ;;  %v1600_v55 = vpop.xlane.xlu0 %1599 }
 0x934   :  { %v1604_v51 = vmax.f32 %v1600_v55, 1e-20 }
 0x936   :  { %2192 = vrcp.f32 %v1604_v51 }
 0x938   :  { %v2187_v3 = vpop.eup %2186 }
 0x939   :  { %v1609_v37 = vmul.f32 %v2187_v3, %v2179_v16 }
 0x93b   :  { %1965 = vmatprep.mubr.msk.f32.mxu0 %vm319_vm4, %v1609_v37 }
 0x93c   :  { %v2189_v38 = vpop.eup %2188 }
 0x93d   :  { %v2191_v54 = vpop.eup %2190  ;;  %v1611_v57 = vmul.f32 %v2189_v38, %v2183_v22 }
 0x93e   :  { %v1610_v59 = vmul.f32 %v2191_v54, %v2181_v43 }
 0x940   :  { %v2193_v19 = vpop.eup %2192  ;;  %1966 = vmatmul.mubr.msk.f32.vlgmr.msra.gmra.mrb[20].mxu0 %vm319_vm4, %v1610_v59 }
 0x941   :  { %1968 = vmatprep.mubr.msk.f32.mxu0 %vm319_vm4, %v1611_v57  ;;  %v1612_v60 = vmul.f32 %v2193_v19, %v2185_v5 }
 0x944   :  { %1969 = vmatmul.mubr.msk.f32.gmra.mrb[22].mxu0 %vm319_vm4, %v1612_v60 }
 0xa13   :  { %v1967_v46 = vpop.f32.mrb[20].mxu0 }
 0xa14   :  { %v1703_v47 = vadd.f32 %v1967_v46, %v1762_v11  ;;  %v1697_v4 = vpop.f32.mrb[21].mxu0 }
 0xa15   :  { %v1698_v10 = vadd.f32 %v1762_v11, %v1697_v4 }
 0xa16   :  { %1717 = vst.msk [vmem:[%s2693_s8 + $0x8] sm:$0xff] %vm1387_vm12, %v1703_v47 }
 0xa17   :  { %1716 = vst.msk [vmem:[%s2693_s8] sm:$0xff] %vm1387_vm12, %v1698_v10  ;;  %v1970_v13 = vpop.f32.mrb[22].mxu0 }
 0xa18   :  { %v1713_v33 = vadd.f32 %v1970_v13, %v1762_v11  ;;  %v1707_v61 = vpop.f32.mrb[23].mxu0 }
 0xa19   :  { %v1708_v15 = vadd.f32 %v1762_v11, %v1707_v61 }
 0xa1a   :  { %1719 = vst.msk [vmem:[%s2693_s8 + $0x18] sm:$0xff] %vm1387_vm12, %v1713_v33 }
 0xa1b   :  { %1718 = vst.msk [vmem:[%s2693_s8 + $0x10] sm:$0xff] %vm1387_vm12, %v1708_v15 }

</bundles_post_ra>
